<compile_context>
chip_gen: v7x
topology: tpu7x:2x2x1
jax: 0.10.0
libtpu: 0.0.40
codegen_flags: <defaults>
</compile_context>

<pallas_src>
import jax
import jax.numpy as jnp
from jax.experimental import pallas as pl
from jax.experimental.pallas import tpu as pltpu


def _round_up(x, m):
    return ((x + m - 1) // m) * m


def _upsample_conv1x1_kernel(x_ref, w_ref, b_ref, rep_ref, o_ref):
    # x_ref  : (1, C, th, W)      input rows (compact grid)
    # w_ref  : (Cout, C)          1x1 conv weight
    # b_ref  : (Cout, 1)          bias column (broadcasts along lanes)
    # rep_ref: (W, 2W)            one-hot lane-duplication matrix rep[w, 2w+dw] = 1
    # o_ref  : (1, Cout, th, 4W)  fused upsampled output rows
    th = x_ref.shape[2]
    w = w_ref[...]
    b = b_ref[...].astype(jnp.float32)
    rep = rep_ref[...].astype(jnp.float32)

    for r in range(th):  # static unroll over whole image rows in this tile
        x_row = x_ref[0, :, r, :]                                          # (C, W)
        acc = jnp.dot(w, x_row, preferred_element_type=jnp.float32)        # (Cout, W)
        dup = jnp.dot(acc, rep, preferred_element_type=jnp.float32)        # (Cout, 2W)
        row = jnp.concatenate([dup, dup], axis=-1) + b                     # (Cout, 4W)
        o_ref[0, :, r, :] = row.astype(o_ref.dtype)


def _pick_row_tile(H, C, Cout, W, itemsize, budget_bytes=36 << 20, max_rows=128):
    """Rows of the compact image per grid step.

    th must be a multiple of 8 (sublane tiling) unless it equals H.  Sized so
    the double-buffered input+output blocks (with (8,128) VMEM padding) stay
    within `budget_bytes`; capped at `max_rows` to bound the static unroll of
    the per-row loop inside the kernel."""
    def blk_bytes(th):
        pin = C * _round_up(th, 8) * _round_up(W, 128) * itemsize
        pout = Cout * _round_up(th, 8) * _round_up(4 * W, 128) * itemsize
        return 2 * (pin + pout)  # double buffering of input + output blocks

    cands = set()
    if H <= max_rows:
        cands.add(H)                       # full extent (always layout-legal)
    t = 8
    while t <= min(H, max_rows):
        cands.add(t)
        t += 8
    best = None
    for th in sorted(cands):
        if blk_bytes(th) <= budget_bytes:
            best = th
    if best is None:
        best = min(8, H)
    return best


def upsample_forward(x_nchw, weight, bias):
    """Equivalent of:
        up  = F.interpolate(x, scale_factor=2, mode='nearest')
        out = Conv2d(C, C//2, kernel_size=1, stride=1)(up)
    x_nchw: (N, C, H, W); weight: (Cout, C, 1, 1); bias: (Cout,)
    returns: (N, Cout, 2H, 2W)
    """
    N, C, H, W = x_nchw.shape
    Cout = weight.shape[0]
    itemsize = jnp.dtype(x_nchw.dtype).itemsize

    w_mat = weight.reshape(Cout, C)                       # (Cout, C)
    b_col = bias.reshape(Cout, 1).astype(jnp.float32)     # (Cout, 1)
    # One-hot lane-duplication matrix: rep[w, 2w] = rep[w, 2w+1] = 1.
    rep = (jnp.arange(2 * W)[None, :] // 2 == jnp.arange(W)[:, None]).astype(jnp.float32)

    th = _pick_row_tile(H, C, Cout, W, itemsize)
    n_tiles = pl.cdiv(H, th)
    # v7x megacore: make sure there are at least 2 parallel grid steps.
    if N * n_tiles < 2 and H > 8:
        th = max(8, _round_up((H + 1) // 2, 8))
        n_tiles = pl.cdiv(H, th)

    grid = (N, n_tiles)

    out4 = pl.pallas_call(
        _upsample_conv1x1_kernel,
        out_shape=jax.ShapeDtypeStruct((N, Cout, H, 4 * W), x_nchw.dtype),
        grid_spec=pltpu.PrefetchScalarGridSpec(
            num_scalar_prefetch=0,
            grid=grid,
            in_specs=[
                pl.BlockSpec((1, C, th, W), lambda n, i: (n, 0, i, 0)),    # activations
                pl.BlockSpec((Cout, C), lambda n, i: (0, 0)),              # weight (resident)
                pl.BlockSpec((Cout, 1), lambda n, i: (0, 0)),              # bias (resident)
                pl.BlockSpec((W, 2 * W), lambda n, i: (0, 0)),             # rep matrix (resident)
            ],
            out_specs=pl.BlockSpec((1, Cout, th, 4 * W), lambda n, i: (n, 0, i, 0)),
        ),
        compiler_params=pltpu.CompilerParams(
            dimension_semantics=("parallel", "parallel"),
            vmem_limit_bytes=48 << 20,
        ),
    )(x_nchw, w_mat, b_col, rep)

    # Free metadata-only reshape: (N, Cout, H, 4W) row-major == (N, Cout, 2H, 2W).
    return out4.reshape(N, Cout, 2 * H, 2 * W)


if __name__ == "__main__":
    # Small deterministic example consistent with the module: channel=4.
    N, C, H, W = 2, 4, 16, 16
    Cout = C // 2

    key = jax.random.PRNGKey(0)
    kx, kw, kb = jax.random.split(key, 3)

    x = jax.random.normal(kx, (N, C, H, W), dtype=jnp.float32)
    # Deterministic synthetic parameters (shapes from nn.Conv2d(C, C//2, 1, 1)).
    weight = jax.random.normal(kw, (Cout, C, 1, 1), dtype=jnp.float32) * 0.1
    bias = jax.random.normal(kb, (Cout,), dtype=jnp.float32) * 0.1

    out = upsample_forward(x, weight, bias)
    out = jax.block_until_ready(out)

    # Pure-JAX reference (upsample-then-conv, exactly as in the module).
    up_ref = jnp.repeat(jnp.repeat(x, 2, axis=2), 2, axis=3)
    ref = jnp.einsum("nchw,oc->nohw", up_ref, weight.reshape(Cout, C)) \
        + bias[None, :, None, None]

    assert out.shape == (N, Cout, 2 * H, 2 * W), out.shape
    assert jnp.allclose(out, ref, atol=1e-5, rtol=1e-5)
    print("KERNEL_OK")
</pallas_src>

<mosaic_0001>
module attributes {stable_mosaic.version = 11 : i64} {
  func.func @_upsample_conv1x1_kernel(%arg0: i32, %arg1: i32, %arg2: memref<1x4x16x16xf32, #tpu.memory_space<vmem>>, %arg3: memref<2x4xf32, #tpu.memory_space<vmem>>, %arg4: memref<2x1xf32, #tpu.memory_space<vmem>>, %arg5: memref<16x32xf32, #tpu.memory_space<vmem>>, %arg6: memref<1x2x16x64xf32, #tpu.memory_space<vmem>>) attributes {dimension_semantics = [#tpu.dimension_semantics<parallel>, #tpu.dimension_semantics<parallel>], iteration_bounds = array<i64: 2, 1>, scalar_prefetch = 0 : i64, scratch_operands = 0 : i64, tpu.core_type = #tpu.core_type<tc>, window_params = [{transform_indices = @transform_0, window_bounds = array<i64: 1, 4, 16, 16>}, {pipeline_mode = #tpu.pipeline_mode<synchronous>, transform_indices = @transform_1, window_bounds = array<i64: 2, 4>}, {pipeline_mode = #tpu.pipeline_mode<synchronous>, transform_indices = @transform_2, window_bounds = array<i64: 2, 1>}, {pipeline_mode = #tpu.pipeline_mode<synchronous>, transform_indices = @transform_3, window_bounds = array<i64: 16, 32>}, {transform_indices = @transform_4, window_bounds = array<i64: 1, 2, 16, 64>}]} {
    %c0 = arith.constant 0 : index
    %c0_0 = arith.constant 0 : index
    %0 = vector.load %arg3[%c0, %c0_0] : memref<2x4xf32, #tpu.memory_space<vmem>>, vector<2x4xf32>
    %c0_1 = arith.constant 0 : index
    %c0_2 = arith.constant 0 : index
    %1 = vector.load %arg4[%c0_1, %c0_2] : memref<2x1xf32, #tpu.memory_space<vmem>>, vector<2x1xf32>
    %c0_3 = arith.constant 0 : index
    %c0_4 = arith.constant 0 : index
    %2 = vector.load %arg5[%c0_3, %c0_4] : memref<16x32xf32, #tpu.memory_space<vmem>>, vector<16x32xf32>
    %c0_5 = arith.constant 0 : index
    %c0_6 = arith.constant 0 : index
    %c0_7 = arith.constant 0 : index
    %c0_8 = arith.constant 0 : index
    %3 = vector.load %arg2[%c0_5, %c0_6, %c0_7, %c0_8] : memref<1x4x16x16xf32, #tpu.memory_space<vmem>>, vector<1x4x1x16xf32>
    %4 = vector.shape_cast %3 : vector<1x4x1x16xf32> to vector<4x16xf32>
    %cst = arith.constant dense<0.000000e+00> : vector<2x16xf32>
    %5 = tpu.matmul %0, %4, %cst {dimension_numbers = #tpu.dot_dimension_numbers<[1], [0], [0], [1], [0, 0, 1, 1], [], []>} : vector<2x4xf32>, vector<4x16xf32>, vector<2x16xf32> -> vector<2x16xf32>
    %cst_9 = arith.constant dense<0.000000e+00> : vector<2x32xf32>
    %6 = tpu.matmul %5, %2, %cst_9 {dimension_numbers = #tpu.dot_dimension_numbers<[1], [0], [0], [1], [0, 0, 1, 1], [], []>} : vector<2x16xf32>, vector<16x32xf32>, vector<2x32xf32> -> vector<2x32xf32>
    %7 = tpu.concatenate %6, %6 in 1 : vector<2x32xf32>, vector<2x32xf32> -> vector<2x64xf32>
    %8 = vector.broadcast %1 : vector<2x1xf32> to vector<2x64xf32>
    %9 = arith.addf %7, %8 : vector<2x64xf32>
    %c0_10 = arith.constant 0 : index
    %c0_11 = arith.constant 0 : index
    %c0_12 = arith.constant 0 : index
    %c0_13 = arith.constant 0 : index
    %10 = vector.load %arg6[%c0_10, %c0_11, %c0_12, %c0_13] : memref<1x2x16x64xf32, #tpu.memory_space<vmem>>, vector<1x2x1x64xf32>
    %11 = vector.shape_cast %10 : vector<1x2x1x64xf32> to vector<2x64xf32>
    %12 = vector.shape_cast %9 : vector<2x64xf32> to vector<1x2x1x64xf32>
    tpu.vector_store %arg6[%c0_10, %c0_11, %c0_12, %c0_13], %12 {strides = array<i32>} : memref<1x2x16x64xf32, #tpu.memory_space<vmem>>, vector<1x2x1x64xf32>,
    %c0_14 = arith.constant 0 : index
    %c0_15 = arith.constant 0 : index
    %c1 = arith.constant 1 : index
    %c0_16 = arith.constant 0 : index
    %13 = vector.load %arg2[%c0_14, %c0_15, %c1, %c0_16] : memref<1x4x16x16xf32, #tpu.memory_space<vmem>>, vector<1x4x1x16xf32>
    %14 = vector.shape_cast %13 : vector<1x4x1x16xf32> to vector<4x16xf32>
    %cst_17 = arith.constant dense<0.000000e+00> : vector<2x16xf32>
    %15 = tpu.matmul %0, %14, %cst_17 {dimension_numbers = #tpu.dot_dimension_numbers<[1], [0], [0], [1], [0, 0, 1, 1], [], []>} : vector<2x4xf32>, vector<4x16xf32>, vector<2x16xf32> -> vector<2x16xf32>
    %cst_18 = arith.constant dense<0.000000e+00> : vector<2x32xf32>
    %16 = tpu.matmul %15, %2, %cst_18 {dimension_numbers = #tpu.dot_dimension_numbers<[1], [0], [0], [1], [0, 0, 1, 1], [], []>} : vector<2x16xf32>, vector<16x32xf32>, vector<2x32xf32> -> vector<2x32xf32>
    %17 = tpu.concatenate %16, %16 in 1 : vector<2x32xf32>, vector<2x32xf32> -> vector<2x64xf32>
    %18 = vector.broadcast %1 : vector<2x1xf32> to vector<2x64xf32>
    %19 = arith.addf %17, %18 : vector<2x64xf32>
    %c0_19 = arith.constant 0 : index
    %c0_20 = arith.constant 0 : index
    %c1_21 = arith.constant 1 : index
    %c0_22 = arith.constant 0 : index
    %20 = vector.load %arg6[%c0_19, %c0_20, %c1_21, %c0_22] : memref<1x2x16x64xf32, #tpu.memory_space<vmem>>, vector<1x2x1x64xf32>
    %21 = vector.shape_cast %20 : vector<1x2x1x64xf32> to vector<2x64xf32>
    %22 = vector.shape_cast %19 : vector<2x64xf32> to vector<1x2x1x64xf32>
    tpu.vector_store %arg6[%c0_19, %c0_20, %c1_21, %c0_22], %22 {strides = array<i32>} : memref<1x2x16x64xf32, #tpu.memory_space<vmem>>, vector<1x2x1x64xf32>,
    %c0_23 = arith.constant 0 : index
    %c0_24 = arith.constant 0 : index
    %c2 = arith.constant 2 : index
    %c0_25 = arith.constant 0 : index
    %23 = vector.load %arg2[%c0_23, %c0_24, %c2, %c0_25] : memref<1x4x16x16xf32, #tpu.memory_space<vmem>>, vector<1x4x1x16xf32>
    %24 = vector.shape_cast %23 : vector<1x4x1x16xf32> to vector<4x16xf32>
    %cst_26 = arith.constant dense<0.000000e+00> : vector<2x16xf32>
    %25 = tpu.matmul %0, %24, %cst_26 {dimension_numbers = #tpu.dot_dimension_numbers<[1], [0], [0], [1], [0, 0, 1, 1], [], []>} : vector<2x4xf32>, vector<4x16xf32>, vector<2x16xf32> -> vector<2x16xf32>
    %cst_27 = arith.constant dense<0.000000e+00> : vector<2x32xf32>
    %26 = tpu.matmul %25, %2, %cst_27 {dimension_numbers = #tpu.dot_dimension_numbers<[1], [0], [0], [1], [0, 0, 1, 1], [], []>} : vector<2x16xf32>, vector<16x32xf32>, vector<2x32xf32> -> vector<2x32xf32>
    %27 = tpu.concatenate %26, %26 in 1 : vector<2x32xf32>, vector<2x32xf32> -> vector<2x64xf32>
    %28 = vector.broadcast %1 : vector<2x1xf32> to vector<2x64xf32>
    %29 = arith.addf %27, %28 : vector<2x64xf32>
    %c0_28 = arith.constant 0 : index
    %c0_29 = arith.constant 0 : index
    %c2_30 = arith.constant 2 : index
    %c0_31 = arith.constant 0 : index
    %30 = vector.load %arg6[%c0_28, %c0_29, %c2_30, %c0_31] : memref<1x2x16x64xf32, #tpu.memory_space<vmem>>, vector<1x2x1x64xf32>
    %31 = vector.shape_cast %30 : vector<1x2x1x64xf32> to vector<2x64xf32>
    %32 = vector.shape_cast %29 : vector<2x64xf32> to vector<1x2x1x64xf32>
    tpu.vector_store %arg6[%c0_28, %c0_29, %c2_30, %c0_31], %32 {strides = array<i32>} : memref<1x2x16x64xf32, #tpu.memory_space<vmem>>, vector<1x2x1x64xf32>,
    %c0_32 = arith.constant 0 : index
    %c0_33 = arith.constant 0 : index
    %c3 = arith.constant 3 : index
    %c0_34 = arith.constant 0 : index
    %33 = vector.load %arg2[%c0_32, %c0_33, %c3, %c0_34] : memref<1x4x16x16xf32, #tpu.memory_space<vmem>>, vector<1x4x1x16xf32>
    %34 = vector.shape_cast %33 : vector<1x4x1x16xf32> to vector<4x16xf32>
    %cst_35 = arith.constant dense<0.000000e+00> : vector<2x16xf32>
    %35 = tpu.matmul %0, %34, %cst_35 {dimension_numbers = #tpu.dot_dimension_numbers<[1], [0], [0], [1], [0, 0, 1, 1], [], []>} : vector<2x4xf32>, vector<4x16xf32>, vector<2x16xf32> -> vector<2x16xf32>
    %cst_36 = arith.constant dense<0.000000e+00> : vector<2x32xf32>
    %36 = tpu.matmul %35, %2, %cst_36 {dimension_numbers = #tpu.dot_dimension_numbers<[1], [0], [0], [1], [0, 0, 1, 1], [], []>} : vector<2x16xf32>, vector<16x32xf32>, vector<2x32xf32> -> vector<2x32xf32>
    %37 = tpu.concatenate %36, %36 in 1 : vector<2x32xf32>, vector<2x32xf32> -> vector<2x64xf32>
    %38 = vector.broadcast %1 : vector<2x1xf32> to vector<2x64xf32>
    %39 = arith.addf %37, %38 : vector<2x64xf32>
    %c0_37 = arith.constant 0 : index
    %c0_38 = arith.constant 0 : index
    %c3_39 = arith.constant 3 : index
    %c0_40 = arith.constant 0 : index
    %40 = vector.load %arg6[%c0_37, %c0_38, %c3_39, %c0_40] : memref<1x2x16x64xf32, #tpu.memory_space<vmem>>, vector<1x2x1x64xf32>
    %41 = vector.shape_cast %40 : vector<1x2x1x64xf32> to vector<2x64xf32>
    %42 = vector.shape_cast %39 : vector<2x64xf32> to vector<1x2x1x64xf32>
    tpu.vector_store %arg6[%c0_37, %c0_38, %c3_39, %c0_40], %42 {strides = array<i32>} : memref<1x2x16x64xf32, #tpu.memory_space<vmem>>, vector<1x2x1x64xf32>,
    %c0_41 = arith.constant 0 : index
    %c0_42 = arith.constant 0 : index
    %c4 = arith.constant 4 : index
    %c0_43 = arith.constant 0 : index
    %43 = vector.load %arg2[%c0_41, %c0_42, %c4, %c0_43] : memref<1x4x16x16xf32, #tpu.memory_space<vmem>>, vector<1x4x1x16xf32>
    %44 = vector.shape_cast %43 : vector<1x4x1x16xf32> to vector<4x16xf32>
    %cst_44 = arith.constant dense<0.000000e+00> : vector<2x16xf32>
    %45 = tpu.matmul %0, %44, %cst_44 {dimension_numbers = #tpu.dot_dimension_numbers<[1], [0], [0], [1], [0, 0, 1, 1], [], []>} : vector<2x4xf32>, vector<4x16xf32>, vector<2x16xf32> -> vector<2x16xf32>
    %cst_45 = arith.constant dense<0.000000e+00> : vector<2x32xf32>
    %46 = tpu.matmul %45, %2, %cst_45 {dimension_numbers = #tpu.dot_dimension_numbers<[1], [0], [0], [1], [0, 0, 1, 1], [], []>} : vector<2x16xf32>, vector<16x32xf32>, vector<2x32xf32> -> vector<2x32xf32>
    %47 = tpu.concatenate %46, %46 in 1 : vector<2x32xf32>, vector<2x32xf32> -> vector<2x64xf32>
    %48 = vector.broadcast %1 : vector<2x1xf32> to vector<2x64xf32>
    %49 = arith.addf %47, %48 : vector<2x64xf32>
    %c0_46 = arith.constant 0 : index
    %c0_47 = arith.constant 0 : index
    %c4_48 = arith.constant 4 : index
    %c0_49 = arith.constant 0 : index
    %50 = vector.load %arg6[%c0_46, %c0_47, %c4_48, %c0_49] : memref<1x2x16x64xf32, #tpu.memory_space<vmem>>, vector<1x2x1x64xf32>
    %51 = vector.shape_cast %50 : vector<1x2x1x64xf32> to vector<2x64xf32>
    %52 = vector.shape_cast %49 : vector<2x64xf32> to vector<1x2x1x64xf32>
    tpu.vector_store %arg6[%c0_46, %c0_47, %c4_48, %c0_49], %52 {strides = array<i32>} : memref<1x2x16x64xf32, #tpu.memory_space<vmem>>, vector<1x2x1x64xf32>,
    %c0_50 = arith.constant 0 : index
    %c0_51 = arith.constant 0 : index
    %c5 = arith.constant 5 : index
    %c0_52 = arith.constant 0 : index
    %53 = vector.load %arg2[%c0_50, %c0_51, %c5, %c0_52] : memref<1x4x16x16xf32, #tpu.memory_space<vmem>>, vector<1x4x1x16xf32>
    %54 = vector.shape_cast %53 : vector<1x4x1x16xf32> to vector<4x16xf32>
    %cst_53 = arith.constant dense<0.000000e+00> : vector<2x16xf32>
    %55 = tpu.matmul %0, %54, %cst_53 {dimension_numbers = #tpu.dot_dimension_numbers<[1], [0], [0], [1], [0, 0, 1, 1], [], []>} : vector<2x4xf32>, vector<4x16xf32>, vector<2x16xf32> -> vector<2x16xf32>
    %cst_54 = arith.constant dense<0.000000e+00> : vector<2x32xf32>
    %56 = tpu.matmul %55, %2, %cst_54 {dimension_numbers = #tpu.dot_dimension_numbers<[1], [0], [0], [1], [0, 0, 1, 1], [], []>} : vector<2x16xf32>, vector<16x32xf32>, vector<2x32xf32> -> vector<2x32xf32>
    %57 = tpu.concatenate %56, %56 in 1 : vector<2x32xf32>, vector<2x32xf32> -> vector<2x64xf32>
    %58 = vector.broadcast %1 : vector<2x1xf32> to vector<2x64xf32>
    %59 = arith.addf %57, %58 : vector<2x64xf32>
    %c0_55 = arith.constant 0 : index
    %c0_56 = arith.constant 0 : index
    %c5_57 = arith.constant 5 : index
    %c0_58 = arith.constant 0 : index
    %60 = vector.load %arg6[%c0_55, %c0_56, %c5_57, %c0_58] : memref<1x2x16x64xf32, #tpu.memory_space<vmem>>, vector<1x2x1x64xf32>
    %61 = vector.shape_cast %60 : vector<1x2x1x64xf32> to vector<2x64xf32>
    %62 = vector.shape_cast %59 : vector<2x64xf32> to vector<1x2x1x64xf32>
    tpu.vector_store %arg6[%c0_55, %c0_56, %c5_57, %c0_58], %62 {strides = array<i32>} : memref<1x2x16x64xf32, #tpu.memory_space<vmem>>, vector<1x2x1x64xf32>,
    %c0_59 = arith.constant 0 : index
    %c0_60 = arith.constant 0 : index
    %c6 = arith.constant 6 : index
    %c0_61 = arith.constant 0 : index
    %63 = vector.load %arg2[%c0_59, %c0_60, %c6, %c0_61] : memref<1x4x16x16xf32, #tpu.memory_space<vmem>>, vector<1x4x1x16xf32>
    %64 = vector.shape_cast %63 : vector<1x4x1x16xf32> to vector<4x16xf32>
    %cst_62 = arith.constant dense<0.000000e+00> : vector<2x16xf32>
    %65 = tpu.matmul %0, %64, %cst_62 {dimension_numbers = #tpu.dot_dimension_numbers<[1], [0], [0], [1], [0, 0, 1, 1], [], []>} : vector<2x4xf32>, vector<4x16xf32>, vector<2x16xf32> -> vector<2x16xf32>
    %cst_63 = arith.constant dense<0.000000e+00> : vector<2x32xf32>
    %66 = tpu.matmul %65, %2, %cst_63 {dimension_numbers = #tpu.dot_dimension_numbers<[1], [0], [0], [1], [0, 0, 1, 1], [], []>} : vector<2x16xf32>, vector<16x32xf32>, vector<2x32xf32> -> vector<2x32xf32>
    %67 = tpu.concatenate %66, %66 in 1 : vector<2x32xf32>, vector<2x32xf32> -> vector<2x64xf32>
    %68 = vector.broadcast %1 : vector<2x1xf32> to vector<2x64xf32>
    %69 = arith.addf %67, %68 : vector<2x64xf32>
    %c0_64 = arith.constant 0 : index
    %c0_65 = arith.constant 0 : index
    %c6_66 = arith.constant 6 : index
    %c0_67 = arith.constant 0 : index
    %70 = vector.load %arg6[%c0_64, %c0_65, %c6_66, %c0_67] : memref<1x2x16x64xf32, #tpu.memory_space<vmem>>, vector<1x2x1x64xf32>
    %71 = vector.shape_cast %70 : vector<1x2x1x64xf32> to vector<2x64xf32>
    %72 = vector.shape_cast %69 : vector<2x64xf32> to vector<1x2x1x64xf32>
    tpu.vector_store %arg6[%c0_64, %c0_65, %c6_66, %c0_67], %72 {strides = array<i32>} : memref<1x2x16x64xf32, #tpu.memory_space<vmem>>, vector<1x2x1x64xf32>,
    %c0_68 = arith.constant 0 : index
    %c0_69 = arith.constant 0 : index
    %c7 = arith.constant 7 : index
    %c0_70 = arith.constant 0 : index
    %73 = vector.load %arg2[%c0_68, %c0_69, %c7, %c0_70] : memref<1x4x16x16xf32, #tpu.memory_space<vmem>>, vector<1x4x1x16xf32>
    %74 = vector.shape_cast %73 : vector<1x4x1x16xf32> to vector<4x16xf32>
    %cst_71 = arith.constant dense<0.000000e+00> : vector<2x16xf32>
    %75 = tpu.matmul %0, %74, %cst_71 {dimension_numbers = #tpu.dot_dimension_numbers<[1], [0], [0], [1], [0, 0, 1, 1], [], []>} : vector<2x4xf32>, vector<4x16xf32>, vector<2x16xf32> -> vector<2x16xf32>
    %cst_72 = arith.constant dense<0.000000e+00> : vector<2x32xf32>
    %76 = tpu.matmul %75, %2, %cst_72 {dimension_numbers = #tpu.dot_dimension_numbers<[1], [0], [0], [1], [0, 0, 1, 1], [], []>} : vector<2x16xf32>, vector<16x32xf32>, vector<2x32xf32> -> vector<2x32xf32>
    %77 = tpu.concatenate %76, %76 in 1 : vector<2x32xf32>, vector<2x32xf32> -> vector<2x64xf32>
    %78 = vector.broadcast %1 : vector<2x1xf32> to vector<2x64xf32>
    %79 = arith.addf %77, %78 : vector<2x64xf32>
    %c0_73 = arith.constant 0 : index
    %c0_74 = arith.constant 0 : index
    %c7_75 = arith.constant 7 : index
    %c0_76 = arith.constant 0 : index
    %80 = vector.load %arg6[%c0_73, %c0_74, %c7_75, %c0_76] : memref<1x2x16x64xf32, #tpu.memory_space<vmem>>, vector<1x2x1x64xf32>
    %81 = vector.shape_cast %80 : vector<1x2x1x64xf32> to vector<2x64xf32>
    %82 = vector.shape_cast %79 : vector<2x64xf32> to vector<1x2x1x64xf32>
    tpu.vector_store %arg6[%c0_73, %c0_74, %c7_75, %c0_76], %82 {strides = array<i32>} : memref<1x2x16x64xf32, #tpu.memory_space<vmem>>, vector<1x2x1x64xf32>,
    %c0_77 = arith.constant 0 : index
    %c0_78 = arith.constant 0 : index
    %c8 = arith.constant 8 : index
    %c0_79 = arith.constant 0 : index
    %83 = vector.load %arg2[%c0_77, %c0_78, %c8, %c0_79] : memref<1x4x16x16xf32, #tpu.memory_space<vmem>>, vector<1x4x1x16xf32>
    %84 = vector.shape_cast %83 : vector<1x4x1x16xf32> to vector<4x16xf32>
    %cst_80 = arith.constant dense<0.000000e+00> : vector<2x16xf32>
    %85 = tpu.matmul %0, %84, %cst_80 {dimension_numbers = #tpu.dot_dimension_numbers<[1], [0], [0], [1], [0, 0, 1, 1], [], []>} : vector<2x4xf32>, vector<4x16xf32>, vector<2x16xf32> -> vector<2x16xf32>
    %cst_81 = arith.constant dense<0.000000e+00> : vector<2x32xf32>
    %86 = tpu.matmul %85, %2, %cst_81 {dimension_numbers = #tpu.dot_dimension_numbers<[1], [0], [0], [1], [0, 0, 1, 1], [], []>} : vector<2x16xf32>, vector<16x32xf32>, vector<2x32xf32> -> vector<2x32xf32>
    %87 = tpu.concatenate %86, %86 in 1 : vector<2x32xf32>, vector<2x32xf32> -> vector<2x64xf32>
    %88 = vector.broadcast %1 : vector<2x1xf32> to vector<2x64xf32>
    %89 = arith.addf %87, %88 : vector<2x64xf32>
    %c0_82 = arith.constant 0 : index
    %c0_83 = arith.constant 0 : index
    %c8_84 = arith.constant 8 : index
    %c0_85 = arith.constant 0 : index
    %90 = vector.load %arg6[%c0_82, %c0_83, %c8_84, %c0_85] : memref<1x2x16x64xf32, #tpu.memory_space<vmem>>, vector<1x2x1x64xf32>
    %91 = vector.shape_cast %90 : vector<1x2x1x64xf32> to vector<2x64xf32>
    %92 = vector.shape_cast %89 : vector<2x64xf32> to vector<1x2x1x64xf32>
    tpu.vector_store %arg6[%c0_82, %c0_83, %c8_84, %c0_85], %92 {strides = array<i32>} : memref<1x2x16x64xf32, #tpu.memory_space<vmem>>, vector<1x2x1x64xf32>,
    %c0_86 = arith.constant 0 : index
    %c0_87 = arith.constant 0 : index
    %c9 = arith.constant 9 : index
    %c0_88 = arith.constant 0 : index
    %93 = vector.load %arg2[%c0_86, %c0_87, %c9, %c0_88] : memref<1x4x16x16xf32, #tpu.memory_space<vmem>>, vector<1x4x1x16xf32>
    %94 = vector.shape_cast %93 : vector<1x4x1x16xf32> to vector<4x16xf32>
    %cst_89 = arith.constant dense<0.000000e+00> : vector<2x16xf32>
    %95 = tpu.matmul %0, %94, %cst_89 {dimension_numbers = #tpu.dot_dimension_numbers<[1], [0], [0], [1], [0, 0, 1, 1], [], []>} : vector<2x4xf32>, vector<4x16xf32>, vector<2x16xf32> -> vector<2x16xf32>
    %cst_90 = arith.constant dense<0.000000e+00> : vector<2x32xf32>
    %96 = tpu.matmul %95, %2, %cst_90 {dimension_numbers = #tpu.dot_dimension_numbers<[1], [0], [0], [1], [0, 0, 1, 1], [], []>} : vector<2x16xf32>, vector<16x32xf32>, vector<2x32xf32> -> vector<2x32xf32>
    %97 = tpu.concatenate %96, %96 in 1 : vector<2x32xf32>, vector<2x32xf32> -> vector<2x64xf32>
    %98 = vector.broadcast %1 : vector<2x1xf32> to vector<2x64xf32>
    %99 = arith.addf %97, %98 : vector<2x64xf32>
    %c0_91 = arith.constant 0 : index
    %c0_92 = arith.constant 0 : index
    %c9_93 = arith.constant 9 : index
    %c0_94 = arith.constant 0 : index
    %100 = vector.load %arg6[%c0_91, %c0_92, %c9_93, %c0_94] : memref<1x2x16x64xf32, #tpu.memory_space<vmem>>, vector<1x2x1x64xf32>
    %101 = vector.shape_cast %100 : vector<1x2x1x64xf32> to vector<2x64xf32>
    %102 = vector.shape_cast %99 : vector<2x64xf32> to vector<1x2x1x64xf32>
    tpu.vector_store %arg6[%c0_91, %c0_92, %c9_93, %c0_94], %102 {strides = array<i32>} : memref<1x2x16x64xf32, #tpu.memory_space<vmem>>, vector<1x2x1x64xf32>,
    %c0_95 = arith.constant 0 : index
    %c0_96 = arith.constant 0 : index
    %c10 = arith.constant 10 : index
    %c0_97 = arith.constant 0 : index
    %103 = vector.load %arg2[%c0_95, %c0_96, %c10, %c0_97] : memref<1x4x16x16xf32, #tpu.memory_space<vmem>>, vector<1x4x1x16xf32>
    %104 = vector.shape_cast %103 : vector<1x4x1x16xf32> to vector<4x16xf32>
    %cst_98 = arith.constant dense<0.000000e+00> : vector<2x16xf32>
    %105 = tpu.matmul %0, %104, %cst_98 {dimension_numbers = #tpu.dot_dimension_numbers<[1], [0], [0], [1], [0, 0, 1, 1], [], []>} : vector<2x4xf32>, vector<4x16xf32>, vector<2x16xf32> -> vector<2x16xf32>
    %cst_99 = arith.constant dense<0.000000e+00> : vector<2x32xf32>
    %106 = tpu.matmul %105, %2, %cst_99 {dimension_numbers = #tpu.dot_dimension_numbers<[1], [0], [0], [1], [0, 0, 1, 1], [], []>} : vector<2x16xf32>, vector<16x32xf32>, vector<2x32xf32> -> vector<2x32xf32>
    %107 = tpu.concatenate %106, %106 in 1 : vector<2x32xf32>, vector<2x32xf32> -> vector<2x64xf32>
    %108 = vector.broadcast %1 : vector<2x1xf32> to vector<2x64xf32>
    %109 = arith.addf %107, %108 : vector<2x64xf32>
    %c0_100 = arith.constant 0 : index
    %c0_101 = arith.constant 0 : index
    %c10_102 = arith.constant 10 : index
    %c0_103 = arith.constant 0 : index
    %110 = vector.load %arg6[%c0_100, %c0_101, %c10_102, %c0_103] : memref<1x2x16x64xf32, #tpu.memory_space<vmem>>, vector<1x2x1x64xf32>
    %111 = vector.shape_cast %110 : vector<1x2x1x64xf32> to vector<2x64xf32>
    %112 = vector.shape_cast %109 : vector<2x64xf32> to vector<1x2x1x64xf32>
    tpu.vector_store %arg6[%c0_100, %c0_101, %c10_102, %c0_103], %112 {strides = array<i32>} : memref<1x2x16x64xf32, #tpu.memory_space<vmem>>, vector<1x2x1x64xf32>,
    %c0_104 = arith.constant 0 : index
    %c0_105 = arith.constant 0 : index
    %c11 = arith.constant 11 : index
    %c0_106 = arith.constant 0 : index
    %113 = vector.load %arg2[%c0_104, %c0_105, %c11, %c0_106] : memref<1x4x16x16xf32, #tpu.memory_space<vmem>>, vector<1x4x1x16xf32>
    %114 = vector.shape_cast %113 : vector<1x4x1x16xf32> to vector<4x16xf32>
    %cst_107 = arith.constant dense<0.000000e+00> : vector<2x16xf32>
    %115 = tpu.matmul %0, %114, %cst_107 {dimension_numbers = #tpu.dot_dimension_numbers<[1], [0], [0], [1], [0, 0, 1, 1], [], []>} : vector<2x4xf32>, vector<4x16xf32>, vector<2x16xf32> -> vector<2x16xf32>
    %cst_108 = arith.constant dense<0.000000e+00> : vector<2x32xf32>
    %116 = tpu.matmul %115, %2, %cst_108 {dimension_numbers = #tpu.dot_dimension_numbers<[1], [0], [0], [1], [0, 0, 1, 1], [], []>} : vector<2x16xf32>, vector<16x32xf32>, vector<2x32xf32> -> vector<2x32xf32>
    %117 = tpu.concatenate %116, %116 in 1 : vector<2x32xf32>, vector<2x32xf32> -> vector<2x64xf32>
    %118 = vector.broadcast %1 : vector<2x1xf32> to vector<2x64xf32>
    %119 = arith.addf %117, %118 : vector<2x64xf32>
    %c0_109 = arith.constant 0 : index
    %c0_110 = arith.constant 0 : index
    %c11_111 = arith.constant 11 : index
    %c0_112 = arith.constant 0 : index
    %120 = vector.load %arg6[%c0_109, %c0_110, %c11_111, %c0_112] : memref<1x2x16x64xf32, #tpu.memory_space<vmem>>, vector<1x2x1x64xf32>
    %121 = vector.shape_cast %120 : vector<1x2x1x64xf32> to vector<2x64xf32>
    %122 = vector.shape_cast %119 : vector<2x64xf32> to vector<1x2x1x64xf32>
    tpu.vector_store %arg6[%c0_109, %c0_110, %c11_111, %c0_112], %122 {strides = array<i32>} : memref<1x2x16x64xf32, #tpu.memory_space<vmem>>, vector<1x2x1x64xf32>,
    %c0_113 = arith.constant 0 : index
    %c0_114 = arith.constant 0 : index
    %c12 = arith.constant 12 : index
    %c0_115 = arith.constant 0 : index
    %123 = vector.load %arg2[%c0_113, %c0_114, %c12, %c0_115] : memref<1x4x16x16xf32, #tpu.memory_space<vmem>>, vector<1x4x1x16xf32>
    %124 = vector.shape_cast %123 : vector<1x4x1x16xf32> to vector<4x16xf32>
    %cst_116 = arith.constant dense<0.000000e+00> : vector<2x16xf32>
    %125 = tpu.matmul %0, %124, %cst_116 {dimension_numbers = #tpu.dot_dimension_numbers<[1], [0], [0], [1], [0, 0, 1, 1], [], []>} : vector<2x4xf32>, vector<4x16xf32>, vector<2x16xf32> -> vector<2x16xf32>
    %cst_117 = arith.constant dense<0.000000e+00> : vector<2x32xf32>
    %126 = tpu.matmul %125, %2, %cst_117 {dimension_numbers = #tpu.dot_dimension_numbers<[1], [0], [0], [1], [0, 0, 1, 1], [], []>} : vector<2x16xf32>, vector<16x32xf32>, vector<2x32xf32> -> vector<2x32xf32>
    %127 = tpu.concatenate %126, %126 in 1 : vector<2x32xf32>, vector<2x32xf32> -> vector<2x64xf32>
    %128 = vector.broadcast %1 : vector<2x1xf32> to vector<2x64xf32>
    %129 = arith.addf %127, %128 : vector<2x64xf32>
    %c0_118 = arith.constant 0 : index
    %c0_119 = arith.constant 0 : index
    %c12_120 = arith.constant 12 : index
    %c0_121 = arith.constant 0 : index
    %130 = vector.load %arg6[%c0_118, %c0_119, %c12_120, %c0_121] : memref<1x2x16x64xf32, #tpu.memory_space<vmem>>, vector<1x2x1x64xf32>
    %131 = vector.shape_cast %130 : vector<1x2x1x64xf32> to vector<2x64xf32>
    %132 = vector.shape_cast %129 : vector<2x64xf32> to vector<1x2x1x64xf32>
    tpu.vector_store %arg6[%c0_118, %c0_119, %c12_120, %c0_121], %132 {strides = array<i32>} : memref<1x2x16x64xf32, #tpu.memory_space<vmem>>, vector<1x2x1x64xf32>,
    %c0_122 = arith.constant 0 : index
    %c0_123 = arith.constant 0 : index
    %c13 = arith.constant 13 : index
    %c0_124 = arith.constant 0 : index
    %133 = vector.load %arg2[%c0_122, %c0_123, %c13, %c0_124] : memref<1x4x16x16xf32, #tpu.memory_space<vmem>>, vector<1x4x1x16xf32>
    %134 = vector.shape_cast %133 : vector<1x4x1x16xf32> to vector<4x16xf32>
    %cst_125 = arith.constant dense<0.000000e+00> : vector<2x16xf32>
    %135 = tpu.matmul %0, %134, %cst_125 {dimension_numbers = #tpu.dot_dimension_numbers<[1], [0], [0], [1], [0, 0, 1, 1], [], []>} : vector<2x4xf32>, vector<4x16xf32>, vector<2x16xf32> -> vector<2x16xf32>
    %cst_126 = arith.constant dense<0.000000e+00> : vector<2x32xf32>
    %136 = tpu.matmul %135, %2, %cst_126 {dimension_numbers = #tpu.dot_dimension_numbers<[1], [0], [0], [1], [0, 0, 1, 1], [], []>} : vector<2x16xf32>, vector<16x32xf32>, vector<2x32xf32> -> vector<2x32xf32>
    %137 = tpu.concatenate %136, %136 in 1 : vector<2x32xf32>, vector<2x32xf32> -> vector<2x64xf32>
    %138 = vector.broadcast %1 : vector<2x1xf32> to vector<2x64xf32>
    %139 = arith.addf %137, %138 : vector<2x64xf32>
    %c0_127 = arith.constant 0 : index
    %c0_128 = arith.constant 0 : index
    %c13_129 = arith.constant 13 : index
    %c0_130 = arith.constant 0 : index
    %140 = vector.load %arg6[%c0_127, %c0_128, %c13_129, %c0_130] : memref<1x2x16x64xf32, #tpu.memory_space<vmem>>, vector<1x2x1x64xf32>
    %141 = vector.shape_cast %140 : vector<1x2x1x64xf32> to vector<2x64xf32>
    %142 = vector.shape_cast %139 : vector<2x64xf32> to vector<1x2x1x64xf32>
    tpu.vector_store %arg6[%c0_127, %c0_128, %c13_129, %c0_130], %142 {strides = array<i32>} : memref<1x2x16x64xf32, #tpu.memory_space<vmem>>, vector<1x2x1x64xf32>,
    %c0_131 = arith.constant 0 : index
    %c0_132 = arith.constant 0 : index
    %c14 = arith.constant 14 : index
    %c0_133 = arith.constant 0 : index
    %143 = vector.load %arg2[%c0_131, %c0_132, %c14, %c0_133] : memref<1x4x16x16xf32, #tpu.memory_space<vmem>>, vector<1x4x1x16xf32>
    %144 = vector.shape_cast %143 : vector<1x4x1x16xf32> to vector<4x16xf32>
    %cst_134 = arith.constant dense<0.000000e+00> : vector<2x16xf32>
    %145 = tpu.matmul %0, %144, %cst_134 {dimension_numbers = #tpu.dot_dimension_numbers<[1], [0], [0], [1], [0, 0, 1, 1], [], []>} : vector<2x4xf32>, vector<4x16xf32>, vector<2x16xf32> -> vector<2x16xf32>
    %cst_135 = arith.constant dense<0.000000e+00> : vector<2x32xf32>
    %146 = tpu.matmul %145, %2, %cst_135 {dimension_numbers = #tpu.dot_dimension_numbers<[1], [0], [0], [1], [0, 0, 1, 1], [], []>} : vector<2x16xf32>, vector<16x32xf32>, vector<2x32xf32> -> vector<2x32xf32>
    %147 = tpu.concatenate %146, %146 in 1 : vector<2x32xf32>, vector<2x32xf32> -> vector<2x64xf32>
    %148 = vector.broadcast %1 : vector<2x1xf32> to vector<2x64xf32>
    %149 = arith.addf %147, %148 : vector<2x64xf32>
    %c0_136 = arith.constant 0 : index
    %c0_137 = arith.constant 0 : index
    %c14_138 = arith.constant 14 : index
    %c0_139 = arith.constant 0 : index
    %150 = vector.load %arg6[%c0_136, %c0_137, %c14_138, %c0_139] : memref<1x2x16x64xf32, #tpu.memory_space<vmem>>, vector<1x2x1x64xf32>
    %151 = vector.shape_cast %150 : vector<1x2x1x64xf32> to vector<2x64xf32>
    %152 = vector.shape_cast %149 : vector<2x64xf32> to vector<1x2x1x64xf32>
    tpu.vector_store %arg6[%c0_136, %c0_137, %c14_138, %c0_139], %152 {strides = array<i32>} : memref<1x2x16x64xf32, #tpu.memory_space<vmem>>, vector<1x2x1x64xf32>,
    %c0_140 = arith.constant 0 : index
    %c0_141 = arith.constant 0 : index
    %c15 = arith.constant 15 : index
    %c0_142 = arith.constant 0 : index
    %153 = vector.load %arg2[%c0_140, %c0_141, %c15, %c0_142] : memref<1x4x16x16xf32, #tpu.memory_space<vmem>>, vector<1x4x1x16xf32>
    %154 = vector.shape_cast %153 : vector<1x4x1x16xf32> to vector<4x16xf32>
    %cst_143 = arith.constant dense<0.000000e+00> : vector<2x16xf32>
    %155 = tpu.matmul %0, %154, %cst_143 {dimension_numbers = #tpu.dot_dimension_numbers<[1], [0], [0], [1], [0, 0, 1, 1], [], []>} : vector<2x4xf32>, vector<4x16xf32>, vector<2x16xf32> -> vector<2x16xf32>
    %cst_144 = arith.constant dense<0.000000e+00> : vector<2x32xf32>
    %156 = tpu.matmul %155, %2, %cst_144 {dimension_numbers = #tpu.dot_dimension_numbers<[1], [0], [0], [1], [0, 0, 1, 1], [], []>} : vector<2x16xf32>, vector<16x32xf32>, vector<2x32xf32> -> vector<2x32xf32>
    %157 = tpu.concatenate %156, %156 in 1 : vector<2x32xf32>, vector<2x32xf32> -> vector<2x64xf32>
    %158 = vector.broadcast %1 : vector<2x1xf32> to vector<2x64xf32>
    %159 = arith.addf %157, %158 : vector<2x64xf32>
    %c0_145 = arith.constant 0 : index
    %c0_146 = arith.constant 0 : index
    %c15_147 = arith.constant 15 : index
    %c0_148 = arith.constant 0 : index
    %160 = vector.load %arg6[%c0_145, %c0_146, %c15_147, %c0_148] : memref<1x2x16x64xf32, #tpu.memory_space<vmem>>, vector<1x2x1x64xf32>
    %161 = vector.shape_cast %160 : vector<1x2x1x64xf32> to vector<2x64xf32>
    %162 = vector.shape_cast %159 : vector<2x64xf32> to vector<1x2x1x64xf32>
    tpu.vector_store %arg6[%c0_145, %c0_146, %c15_147, %c0_148], %162 {strides = array<i32>} : memref<1x2x16x64xf32, #tpu.memory_space<vmem>>, vector<1x2x1x64xf32>,
    return
  }
  func.func @transform_0(%arg0: i32, %arg1: i32) -> (i32, i32, i32, i32) {
    %c0_i32 = arith.constant 0 : i32
    %c0_i32_0 = arith.constant 0 : i32
    %c0_i32_1 = arith.constant 0 : i32
    return %arg0, %c0_i32, %arg1, %c0_i32_0 : i32, i32, i32, i32
  }
  func.func @transform_1(%arg0: i32, %arg1: i32) -> (i32, i32) {
    %c0_i32 = arith.constant 0 : i32
    %c0_i32_0 = arith.constant 0 : i32
    %c0_i32_1 = arith.constant 0 : i32
    return %c0_i32, %c0_i32_0 : i32, i32
  }
  func.func @transform_2(%arg0: i32, %arg1: i32) -> (i32, i32) {
    %c0_i32 = arith.constant 0 : i32
    %c0_i32_0 = arith.constant 0 : i32
    %c0_i32_1 = arith.constant 0 : i32
    return %c0_i32, %c0_i32_0 : i32, i32
  }
  func.func @transform_3(%arg0: i32, %arg1: i32) -> (i32, i32) {
    %c0_i32 = arith.constant 0 : i32
    %c0_i32_0 = arith.constant 0 : i32
    %c0_i32_1 = arith.constant 0 : i32
    return %c0_i32, %c0_i32_0 : i32, i32
  }
  func.func @transform_4(%arg0: i32, %arg1: i32) -> (i32, i32, i32, i32) {
    %c0_i32 = arith.constant 0 : i32
    %c0_i32_0 = arith.constant 0 : i32
    %c0_i32_1 = arith.constant 0 : i32
    return %arg0, %c0_i32, %arg1, %c0_i32_0 : i32, i32, i32, i32
  }
}

</mosaic_0001>

<bundles_post_ra>
// kernel: tpu_custom_call.1
= control target key start
LH: loop header
LB: loop body
LE: loop exit
PB: predicated region body
PF: predicated region fallthrough
CT: control target
= control target key end

     0   :  { %9 = vsyncpa [#allocation3], 0  ;;  %s4860_s0 = inlined_call_operand.hbm [shape: f32[2,4,16,16], index: 0, kind: input, shape index: {}]   ;;  %s4861_s1 = inlined_call_operand.vmem [shape: f32[2,4], index: 1, kind: input, shape index: {}]   ;;  %s4862_s2 = inlined_call_operand.vmem [shape: f32[2,1], index: 2, kind: input, shape index: {}]   ;;  %s4863_s3 = inlined_call_operand.hbm [shape: f32[16,32], index: 3, kind: input, shape index: {}]   ;;  %s4864_s4 = inlined_call_operand.hbm [shape: f32[2,2,16,64], index: 4, kind: output, shape index: {}]  }
   0x1   :  { %11 = vsyncpa [#allocation3 + $0x1], 0 }
   0x2   :  { %12 = vsyncpa [#allocation6], 0 }
   0x3   :  { %13 = vsyncpa [#allocation4], 0 }
   0x4   :  { %15 = vsyncpa [#allocation4 + $0x1], 0  ;;  %s4111_s15 = smov 0   ;;  %s4113_s16 = smov 0  }
   0x5   :  { %s4115_s17 = smov 0   ;;  %s4117_s18 = smov 0  }
   0x6   :  { %s4119_s19 = smov 0   ;;  %s4121_s20 = smov 0  }
   0x7 LB: > { %s3456_s21 = sadd.s32 4294967295, %s4071_s20   ;;  %s3457_s22 = sadd.s32 4294967294, %s4071_s20   ;;  %s4071_s20 = sphi %s4121_s20, %s21_s20   ;;  %s4067_s19 = sphi %s4119_s19, %s4888_s19   ;;  %s4063_s18 = sphi %s4117_s18, %s4887_s18   ;;  %s4059_s17 = sphi %s4115_s17, %s4886_s17   ;;  %s4055_s16 = sphi %s4113_s16, %s4885_s16   ;;  %s4051_s15 = sphi %s4111_s15, %s4884_s15  }
   0x8   : > { %p55_p0 = scmp.ne.s32.totalorder %s4055_s16, %s4051_s15  ;;  %p4145_p1 = scmp.eq.s32.totalorder %s3456_s21, 0 }
   0x9   : > { %p4149_p2 = scmp.eq.s32.totalorder %s3456_s21, 1  ;;  %p150_p3 = scmp.eq.s32.totalorder %s3457_s22, 1 }
   0xa   : > { %s4869_s23 = scalar_select %p4145_p1, 1, 0 }
   0xb   : > { %s4870_s24 = scalar_select %p4149_p2, 1, 0 }
   0xc   : > { %p4155_p4 = por %p4145_p1, %p55_p0  ;;  %p3458_p5 = scmp.ge.s32.totalorder %s4071_s20, 1 }
   0xd   : > { %p4160_p6 = por %p150_p3, %p55_p0  ;;  %p157_p7 = scmp.lt.s32.totalorder %s4071_s20, 3 }
   0xe   : > { %s4871_s25 = scalar_select %p4155_p4, 1, 0 }
   0xf   : > { %s4872_s26 = scalar_select %p4160_p6, 1, 0 }
  0x10   : > { %p4165_p8 = pnand %p3458_p5, %p157_p7  ;;  %s4073_s28 = smov [#allocation5]  }
  0x11   : > { %s175_s29 = sshll.u32 %s4073_s28, 4  ;;  %s33_s5 = sadd.s32 1, %s4067_s19  ;;  %s176_s29 = int_to_ptr.vmem [resolvable:$true] %s175_s29 }
  0x12   : > { %s4873_s27 = scalar_select %p4165_p8, 1, 0 }
  0x13   : > { %p3851_p9 = pneg %p4165_p8  ;;  %s3927_s8 = scalar_lea.hbm %s4863_s3, 256 }
  0x14   : > { %p3928_p12 = scmp.ne.s32.totalorder %s4863_s3, %s3927_s8  ;;  %p3934_p5 = scmp.lt.u32.totalorder %s3927_s8, %s4863_s3 }
  0x15   : > { %p4174_p11 = pnand %p3851_p9, %p4145_p1 }
  0x17   : > { %p3929_p13 = pneg %p4174_p11 }
  0x19   : > { %p3930_p0 = pnand %p3929_p13, %p3928_p12 }
  0x1b   : > { %p3931_p3 = pneg %p3930_p0 }
  0x1d   : > { %p3936_p7 = pnand %p3934_p5, %p3931_p3 }
  0x1f   : > { %3939 = shalt.err (!%p3936_p7)
}
  0x20   : > { %s3940_s13 = scalar_lea.vmem %s176_s29, 256  ;;  %p3948_p1 = scmp.lt.s32.totalorder %s176_s29, %s176_s29 }
  0x21   : > { %p3941_p9 = scmp.ne.s32.totalorder %s176_s29, %s3940_s13  ;;  %p3949_p4 = scmp.lt.s32.totalorder %s3940_s13, %s3940_s13 }
  0x23   : > { %p3943_p10 = pnand %p3941_p9, %p3929_p13  ;;  %p3950_p8 = por %p3949_p4, %p3948_p1 }
  0x25   : > { %p3944_p6 = pneg %p3943_p10 }
  0x27   : > { %p3951_p2 = pnand %p3950_p8, %p3944_p6 }
  0x29   : > { %3954 = shalt.err (!%p3951_p2)
}
  0x2a   : > { %s4074_s14 = smov 128   ;;  %s4075_s21 = smov 8  }
  0x2b   : > { %3854 = dma.hbm_to_vmem [thread:$0]  (!%p4174_p11), %s4863_s3, 256, %s176_s29, [#allocation6], %s4074_s14, %s4074_s14, %s4075_s21  }
  0x2c   : > { %p35_p1 = scmp.ge.s32.totalorder %s33_s5, 2  ;;  %s42_s6 = sadd.s32 1, %s4059_s17 }
  0x2d   : > { %p49_p2 = scmp.ne.s32.totalorder %s4059_s17, %s4055_s16  ;;  %p50_p4 = scmp.eq.s32.totalorder %s4071_s20, 0 }
  0x2e   : > { %s4890_s5 = smov (%p35_p1, %s33_s5), 0  ;;  %p4876_p8 = scmp.ne.s32.totalorder %s4870_s24, 0 }
  0x2f   : > { %p4204_p6 = por %p50_p4, %p49_p2  ;;  %s37_s8 = ssub.s32 %s4067_s19, %s4890_s5 }
  0x30   : > { %p4210_p10 = por %p4876_p8, %p49_p2  ;;  %p3864_p12 = scmp.lt.s32.totalorder %s4071_s20, 2 }
  0x31   : > { %p40_p11 = scmp.eq.s32.totalorder %s37_s8, 0  ;;  %s189_s29 = sand.u32 1, %s4059_s17  }
  0x32   : > { %s3461_s9 = sshll.u32 %s189_s29, 6  ;;  %s3521_s11 = sshll.u32 %s4067_s19, 10 }
  0x33   : > { %s4219_s10 = scalar_select %p40_p11, %s4059_s17, %s42_s6  }
  0x34   : > { %s4225_s22 = scalar_lea.hbm %s4860_s0, %s3521_s11  ;;  %s193_s24 = scalar_lea.vmem [#allocation2], %s3461_s9 }
  0x35   : > { %s202_s28 = sshll.u32 %s193_s24, 4  ;;  %p4231_p13 = pnand %p3864_p12, %p4204_p6  ;;  %s4227_s28 = int_to_ptr.vmem [resolvable:$true] %s202_s28 }
  0x36   : > { %s4235_s6 = scalar_lea.sflag [#allocation3], %s189_s29  ;;  %s3955_s12 = scalar_lea.hbm %s4225_s22, 1024 }
  0x37   : > { %p3956_p0 = scmp.ne.s32.totalorder %s4225_s22, %s3955_s12  ;;  %p3957_p3 = pneg %p4231_p13 }
  0x38   : > { %s3960_s7 = scalar_lea.hbm %s4860_s0, 2048  ;;  %p3961_p9 = scmp.lt.u32.totalorder %s4225_s22, %s4860_s0 }
  0x39   : > { %p3958_p5 = pnand %p3957_p3, %p3956_p0  ;;  %p3962_p1 = scmp.lt.u32.totalorder %s3960_s7, %s3955_s12 }
  0x3a   : > { %p3964_p4 = scmp.lt.u32.totalorder %s3955_s12, %s4225_s22 }
  0x3b   : > { %p3959_p7 = pneg %p3958_p5  ;;  %p3963_p2 = por %p3962_p1, %p3961_p9 }
  0x3d   : > { %p3965_p6 = por %p3964_p4, %p3963_p2 }
  0x3f   : > { %p3966_p8 = pnand %p3965_p6, %p3959_p7 }
  0x41   : > { %3969 = shalt.err (!%p3966_p8)
}
  0x42   : > { %s3970_s29 = scalar_lea.vmem %s4227_s28, 1024  ;;  %s4076_s9 = smov [#allocation2]  }
  0x43   : > { %p3971_p12 = scmp.ne.s32.totalorder %s4227_s28, %s3970_s29  ;;  %s3975_s11 = sshll.u32 %s4076_s9, 4  ;;  %s3976_s11 = int_to_ptr.vmem [resolvable:$false] %s3975_s11 }
  0x44   : > { %s3977_s13 = scalar_lea.vmem %s3976_s11, 2048  ;;  %p3978_p5 = scmp.lt.s32.totalorder %s4227_s28, %s3976_s11 }
  0x45   : > { %p3973_p11 = pnand %p3971_p12, %p3957_p3  ;;  %p3979_p9 = scmp.lt.s32.totalorder %s3977_s13, %s3970_s29 }
  0x47   : > { %p3974_p0 = pneg %p3973_p11  ;;  %p3980_p1 = por %p3979_p9, %p3978_p5 }
  0x49   : > { %p3981_p2 = pnand %p3980_p1, %p3974_p0 }
  0x4b   : > { %3984 = shalt.err (!%p3981_p2)
}
  0x4c   : > { %3858 = dma.hbm_to_vmem [thread:$0]  (!%p4231_p13), %s4225_s22, 1024, %s4227_s28, %s4235_s6, %s4074_s14, %s4074_s14, %s4075_s21  }
  0x4d   : > { %p4879_p3 = scmp.ne.s32.totalorder %s4873_s27, 0 }
  0x4e   : > { %s4269_s12 = sand.u32 (!%p4879_p3), 1, %s4055_s16   ;;  %p4880_p7 = scmp.ne.s32.totalorder (!%p4879_p3), %s4871_s25, 0 }
  0x4f   : > { %214 = sbr.rel (%p4879_p3) target bundleno = 721 (0x2d1), region = 36  ;;  %s3465_s7 = sshll.u32 (!%p4879_p3), %s4269_s12, 6 }
  0x50   : > { %s217_s24 = scalar_lea.sflag (!%p4879_p3), [#allocation3], %s4269_s12  ;;  %s4273_s29 = scalar_lea.vmem (!%p4879_p3), [#allocation2], %s3465_s7 }
  0x56   : > { %4038 = dma.done.wait (%p4880_p7), %s217_s24, 1024  }
  0x57   : > { %4040 = vsyncadd (%p4880_p7), %s217_s24, 4294966272  ;;  %p4881_p13 = scmp.ne.s32.totalorder %s4869_s23, 0 }
  0x59   : > { %4042 = dma.done.wait (%p4881_p13), [#allocation6], 256  }
  0x5a   : > { %4044 = vsyncadd (%p4881_p13), [#allocation6], 4294967040  ;;  %v4077_v0 = vmov 0.0   ;;  %vm4078_vm0 = vmmov 0   ;;  %v4079_v1 = vmov 0.0|0.0   ;;  %vm264_vm1 = vcmask 1041409  }
  0x5b   : > { %3603 = vmatprep.subr.mxu0 %v4077_v0  ;;  %3605 = vmatprep.mubr.msk.f32.mxu0 %vm4078_vm0, %v4077_v0  ;;  %vm267_vm2 = vcmask 1042434   ;;  %vm270_vm3 = vcmask 1043459   ;;  %v255_v2 = vld [vmem:[%s4273_s29] sm:$0x1]  ;;  %v256_v3 = vld [vmem:[%s4273_s29 + $0x10] sm:$0x1] }
  0x5c   : > { %3795 = vmatprep.subr.bf16.mxu1 %v4079_v1  ;;  %3612 = vmatprep.mubr.msk.f32.mxu1 %vm4078_vm0, %v4077_v0  ;;  %v257_v4 = vld [vmem:[%s4273_s29 + $0x20] sm:$0x1]  ;;  %v258_v5 = vld [vmem:[%s4273_s29 + $0x30] sm:$0x1]  ;;  %v263_v6 = vrot.slane %v256_v3, 7  ;;  %vm276_vm4 = vcmask 1043456  }
  0x5d   : > { %v266_v7 = vrot.slane %v257_v4, 6  ;;  %vm272_vm5 = vcmask 31744   ;;  %v269_v8 = vrot.slane %v258_v5, 5  ;;  %v4296_v9 = vld [vmem:[%s4861_s1] sm:$0x3]  ;;  %v254_v17 = vld [vmem:[#allocation5 + $0x8] sm:$0xff] }
  0x5e   : > { %v463_v10 = vld [vmem:[%s4273_s29 + $0x1] sm:$0x1]  ;;  %v464_v11 = vld [vmem:[%s4273_s29 + $0x11] sm:$0x1]  ;;  %v265_v13 = vsel %vm264_vm1, %v263_v6, %v255_v2  ;;  %v655_v21 = vld [vmem:[%s4273_s29 + $0x2] sm:$0x1] }
  0x5f   : > { %v253_v12 = vld [vmem:[#allocation5] sm:$0xff]  ;;  %v466_v15 = vld [vmem:[%s4273_s29 + $0x31] sm:$0x1]  ;;  %v471_v16 = vrot.slane %v464_v11, 7  ;;  %v268_v18 = vsel %vm267_vm2, %v266_v7, %v265_v13  ;;  %v656_v22 = vld [vmem:[%s4273_s29 + $0x12] sm:$0x1] }
  0x60   : > { %v465_v14 = vld [vmem:[%s4273_s29 + $0x21] sm:$0x1]  ;;  %v475_v20 = vrot.slane %v466_v15, 5  ;;  %v4306_v23 = vpack.c.bf16 %v254_v17, %v253_v12  ;;  %v271_v24 = vsel %vm270_vm3, %v269_v8, %v268_v18  ;;  %v657_v26 = vld [vmem:[%s4273_s29 + $0x22] sm:$0x1]  ;;  %v663_v28 = vrot.slane %v656_v22, 7 }
  0x61   : > { %v473_v19 = vrot.slane %v465_v14, 6  ;;  %v472_v25 = vsel %vm264_vm1, %v471_v16, %v463_v10  ;;  %v658_v27 = vld [vmem:[%s4273_s29 + $0x32] sm:$0x1]  ;;  %3604 = vmatpush3.msk.msra.mxu0 %vm276_vm4, %v271_v24  ;;  %v665_v30 = vrot.slane %v657_v26, 6  ;;  %v847_v32 = vld [vmem:[%s4273_s29 + $0x3] sm:$0x1] }
  0x62   : > { %v667_v31 = vrot.slane %v658_v27, 5  ;;  %v848_v33 = vld [vmem:[%s4273_s29 + $0x13] sm:$0x1]  ;;  %3797 = vmatpush3.bf16.msra.mxu1 %v4306_v23  ;;  %3606 = vmatmul.mubr.msk.f32.vlgmr.msra.gmra.mrb[0].mxu0 %vm272_vm5, %v4296_v9  ;;  %v664_v35 = vsel %vm264_vm1, %v663_v28, %v655_v21  ;;  %v849_v36 = vld [vmem:[%s4273_s29 + $0x23] sm:$0x1]  ;;  %vm349_vm6 = vcmask 130048  }
  0x63   : > { %v474_v29 = vsel %vm267_vm2, %v473_v19, %v472_v25  ;;  %3615 = vmatprep.subr.mxu0 %v4077_v0  ;;  %v850_v37 = vld [vmem:[%s4273_s29 + $0x33] sm:$0x1]  ;;  %v855_v38 = vrot.slane %v848_v33, 7  ;;  %3617 = vmatprep.mubr.msk.f32.mxu0 %vm4078_vm0, %v4077_v0  ;;  %v666_v39 = vsel %vm267_vm2, %v665_v30, %v664_v35  ;;  %v857_v40 = vrot.slane %v849_v36, 6  ;;  %v1039_v41 = vld [vmem:[%s4273_s29 + $0x4] sm:$0x1] }
  0x64   : > { %v476_v34 = vsel %vm270_vm3, %v475_v20, %v474_v29  ;;  %v1040_v42 = vld [vmem:[%s4273_s29 + $0x14] sm:$0x1]  ;;  %v668_v43 = vsel %vm270_vm3, %v667_v31, %v666_v39  ;;  %v859_v45 = vrot.slane %v850_v37, 5  ;;  %v1041_v46 = vld [vmem:[%s4273_s29 + $0x24] sm:$0x1]  ;;  %3798 = vmatprep.subr.bf16.mxu1 %v4079_v1  ;;  %s4081_s21 = smov 32  }
  0x65   : > { %3616 = vmatpush3.msk.msra.mxu0 %vm276_vm4, %v476_v34  ;;  %v856_v44 = vsel %vm264_vm1, %v855_v38, %v847_v32  ;;  %v1047_v47 = vrot.slane %v1040_v42, 7  ;;  %v1042_v49 = vld [vmem:[%s4273_s29 + $0x34] sm:$0x1]  ;;  %v1049_v50 = vrot.slane %v1041_v46, 6  ;;  %v1232_v51 = vld [vmem:[%s4273_s29 + $0x15] sm:$0x1] }
  0x66   : > { %3627 = vmatprep.subr.mxu0 %v4077_v0  ;;  %v858_v48 = vsel %vm267_vm2, %v857_v40, %v856_v44  ;;  %3618 = vmatmul.mubr.msk.f32.vlgmr.msra.gmra.mrb[2].mxu0 %vm272_vm5, %v4296_v9  ;;  %v1233_v53 = vld [vmem:[%s4273_s29 + $0x25] sm:$0x1]  ;;  %v1239_v54 = vrot.slane %v1232_v51, 7  ;;  %v1424_v56 = vld [vmem:[%s4273_s29 + $0x16] sm:$0x1]  ;;  %v1051_v58 = vrot.slane %v1042_v49, 5 }
  0x67   : > { %v1048_v52 = vsel %vm264_vm1, %v1047_v47, %v1039_v41  ;;  %3628 = vmatpush3.msk.msra.mxu0 %vm276_vm4, %v668_v43  ;;  %3629 = vmatprep.mubr.msk.f32.mxu0 %vm4078_vm0, %v4077_v0  ;;  %v1231_v55 = vld [vmem:[%s4273_s29 + $0x5] sm:$0x1]  ;;  %v860_v57 = vsel %vm270_vm3, %v859_v45, %v858_v48  ;;  %v1234_v60 = vld [vmem:[%s4273_s29 + $0x35] sm:$0x1]  ;;  %v1241_v61 = vrot.slane %v1233_v53, 6  ;;  %v1431_v2 = vrot.slane %v1424_v56, 7 }
  0x68   : > { %3639 = vmatprep.subr.mxu0 %v4077_v0  ;;  %v1050_v59 = vsel %vm267_vm2, %v1049_v50, %v1048_v52  ;;  %v1240_v62 = vsel %vm264_vm1, %v1239_v54, %v1231_v55  ;;  %v1425_v63 = vld [vmem:[%s4273_s29 + $0x26] sm:$0x1]  ;;  %v1616_v4 = vld [vmem:[%s4273_s29 + $0x17] sm:$0x1]  ;;  %v1243_v6 = vrot.slane %v1234_v60, 5  ;;  %vm427_vm7 = vcmask 261120  }
  0x69   : > { %v1423_v3 = vld [vmem:[%s4273_s29 + $0x6] sm:$0x1]  ;;  %v1052_v5 = vsel %vm270_vm3, %v1051_v58, %v1050_v59  ;;  %v1242_v7 = vsel %vm267_vm2, %v1241_v61, %v1240_v62  ;;  %v1426_v8 = vld [vmem:[%s4273_s29 + $0x36] sm:$0x1]  ;;  %v1433_v10 = vrot.slane %v1425_v63, 6  ;;  %v1623_v13 = vrot.slane %v1616_v4, 7 }
  0x6a   : > { %3630 = vmatmul.mubr.msk.f32.vlgmr.msra.gmra.mrb[4].mxu0 %vm272_vm5, %v4296_v9  ;;  %v1432_v11 = vsel %vm264_vm1, %v1431_v2, %v1423_v3  ;;  %v1617_v12 = vld [vmem:[%s4273_s29 + $0x27] sm:$0x1]  ;;  %v1808_v15 = vld [vmem:[%s4273_s29 + $0x18] sm:$0x1]  ;;  %v1244_v16 = vsel %vm270_vm3, %v1243_v6, %v1242_v7  ;;  %v1435_v17 = vrot.slane %v1426_v8, 5  ;;  %s3467_s22 = sshll.u32 %s4269_s12, 5 }
  0x6b   : > { %3640 = vmatpush3.msk.msra.mxu0 %vm276_vm4, %v860_v57  ;;  %3641 = vmatprep.mubr.msk.f32.mxu0 %vm4078_vm0, %v4077_v0  ;;  %v1615_v14 = vld [vmem:[%s4273_s29 + $0x7] sm:$0x1]  ;;  %v1434_v18 = vsel %vm267_vm2, %v1433_v10, %v1432_v11  ;;  %v1618_v19 = vld [vmem:[%s4273_s29 + $0x37] sm:$0x1]  ;;  %v1625_v20 = vrot.slane %v1617_v12, 6  ;;  %v1815_v24 = vrot.slane %v1808_v15, 7 }
  0x6c   : > { %3651 = vmatprep.subr.mxu0 %v4077_v0  ;;  %v1624_v21 = vsel %vm264_vm1, %v1623_v13, %v1615_v14  ;;  %v1809_v22 = vld [vmem:[%s4273_s29 + $0x28] sm:$0x1]  ;;  %v2000_v26 = vld [vmem:[%s4273_s29 + $0x19] sm:$0x1]  ;;  %v1436_v27 = vsel %vm270_vm3, %v1435_v17, %v1434_v18  ;;  %v1627_v28 = vrot.slane %v1618_v19, 5  ;;  %vm460_vm8 = vcmask 516096  }
  0x6d   : > { %v1807_v25 = vld [vmem:[%s4273_s29 + $0x8] sm:$0x1]  ;;  %v1626_v29 = vsel %vm267_vm2, %v1625_v20, %v1624_v21  ;;  %v1810_v30 = vld [vmem:[%s4273_s29 + $0x38] sm:$0x1]  ;;  %v1817_v31 = vrot.slane %v1809_v22, 6  ;;  %v2007_v34 = vrot.slane %v2000_v26, 7 }
  0x6e   : > { %3642 = vmatmul.mubr.msk.f32.vlgmr.msra.gmra.mrb[6].mxu0 %vm272_vm5, %v4296_v9  ;;  %v1816_v32 = vsel %vm264_vm1, %v1815_v24, %v1807_v25  ;;  %v2001_v33 = vld [vmem:[%s4273_s29 + $0x29] sm:$0x1]  ;;  %v2192_v36 = vld [vmem:[%s4273_s29 + $0x1a] sm:$0x1]  ;;  %v1628_v37 = vsel %vm270_vm3, %v1627_v28, %v1626_v29  ;;  %v1819_v38 = vrot.slane %v1810_v30, 5  ;;  %s4651_s28 = scalar_lea.vmem [#allocation7], %s3467_s22 }
  0x6f   : > { %3652 = vmatpush3.msk.msra.mxu0 %vm276_vm4, %v1052_v5  ;;  %3653 = vmatprep.mubr.msk.f32.mxu0 %vm4078_vm0, %v4077_v0  ;;  %v1999_v35 = vld [vmem:[%s4273_s29 + $0x9] sm:$0x1]  ;;  %v1818_v39 = vsel %vm267_vm2, %v1817_v31, %v1816_v32  ;;  %v2002_v40 = vld [vmem:[%s4273_s29 + $0x39] sm:$0x1]  ;;  %v2009_v41 = vrot.slane %v2001_v33, 6  ;;  %v2199_v44 = vrot.slane %v2192_v36, 7 }
  0x70   : > { %3663 = vmatprep.subr.mxu0 %v4077_v0  ;;  %v2008_v42 = vsel %vm264_vm1, %v2007_v34, %v1999_v35  ;;  %v2193_v43 = vld [vmem:[%s4273_s29 + $0x2a] sm:$0x1]  ;;  %v2384_v46 = vld [vmem:[%s4273_s29 + $0x1b] sm:$0x1]  ;;  %v1820_v47 = vsel %vm270_vm3, %v1819_v38, %v1818_v39  ;;  %v2011_v48 = vrot.slane %v2002_v40, 5  ;;  %s3522_s8 = sshll.u32 %s4063_s18, 9 }
  0x71   : > { %v2191_v45 = vld [vmem:[%s4273_s29 + $0xa] sm:$0x1]  ;;  %v2010_v49 = vsel %vm267_vm2, %v2009_v41, %v2008_v42  ;;  %v2194_v50 = vld [vmem:[%s4273_s29 + $0x3a] sm:$0x1]  ;;  %v2201_v51 = vrot.slane %v2193_v43, 6  ;;  %v2391_v54 = vrot.slane %v2384_v46, 7  ;;  %s4804_s13 = scalar_lea.hbm %s4864_s4, %s3522_s8 }
  0x72   : > { %3654 = vmatmul.mubr.msk.f32.vlgmr.msra.gmra.mrb[8].mxu0 %vm272_vm5, %v4296_v9  ;;  %v2200_v52 = vsel %vm264_vm1, %v2199_v44, %v2191_v45  ;;  %v2385_v53 = vld [vmem:[%s4273_s29 + $0x2b] sm:$0x1]  ;;  %v2576_v56 = vld [vmem:[%s4273_s29 + $0x1c] sm:$0x1]  ;;  %v2012_v57 = vsel %vm270_vm3, %v2011_v48, %v2010_v49  ;;  %v2203_v58 = vrot.slane %v2194_v50, 5  ;;  %s3359_s6 = sshll.u32 %s4651_s28, 4  ;;  %s4806_s6 = int_to_ptr.vmem [resolvable:$true] %s3359_s6 }
  0x73   : > { %3664 = vmatpush3.msk.msra.mxu0 %vm276_vm4, %v1244_v16  ;;  %3665 = vmatprep.mubr.msk.f32.mxu0 %vm4078_vm0, %v4077_v0  ;;  %v2383_v55 = vld [vmem:[%s4273_s29 + $0xb] sm:$0x1]  ;;  %v2202_v59 = vsel %vm267_vm2, %v2201_v51, %v2200_v52  ;;  %v2386_v60 = vld [vmem:[%s4273_s29 + $0x3b] sm:$0x1]  ;;  %v2393_v61 = vrot.slane %v2385_v53, 6  ;;  %v2583_v2 = vrot.slane %v2576_v56, 7 }
  0x74   : > { %3675 = vmatprep.subr.mxu0 %v4077_v0  ;;  %v2392_v62 = vsel %vm264_vm1, %v2391_v54, %v2383_v55  ;;  %v2577_v63 = vld [vmem:[%s4273_s29 + $0x2c] sm:$0x1]  ;;  %v2768_v4 = vld [vmem:[%s4273_s29 + $0x1d] sm:$0x1]  ;;  %v2204_v5 = vsel %vm270_vm3, %v2203_v58, %v2202_v59  ;;  %v2395_v6 = vrot.slane %v2386_v60, 5  ;;  %s3344_s18 = scalar_lea.sflag [#allocation4], %s4269_s12 }
  0x75   : > { %v2575_v3 = vld [vmem:[%s4273_s29 + $0xc] sm:$0x1]  ;;  %v2394_v7 = vsel %vm267_vm2, %v2393_v61, %v2392_v62  ;;  %v2578_v8 = vld [vmem:[%s4273_s29 + $0x3c] sm:$0x1]  ;;  %v2585_v10 = vrot.slane %v2577_v63, 6  ;;  %v2775_v13 = vrot.slane %v2768_v4, 7 }
  0x76   : > { %3666 = vmatmul.mubr.msk.f32.vlgmr.msra.gmra.mrb[10].mxu0 %vm272_vm5, %v4296_v9  ;;  %v2584_v11 = vsel %vm264_vm1, %v2583_v2, %v2575_v3  ;;  %v2769_v12 = vld [vmem:[%s4273_s29 + $0x2d] sm:$0x1]  ;;  %v2960_v15 = vld [vmem:[%s4273_s29 + $0x1e] sm:$0x1]  ;;  %v2396_v16 = vsel %vm270_vm3, %v2395_v6, %v2394_v7  ;;  %v2587_v17 = vrot.slane %v2578_v8, 5  ;;  %s3985_s7 = scalar_lea.vmem %s4806_s6, 512 }
  0x77   : > { %3676 = vmatpush3.msk.msra.mxu0 %vm276_vm4, %v1436_v27  ;;  %3677 = vmatprep.mubr.msk.f32.mxu0 %vm4078_vm0, %v4077_v0  ;;  %v2767_v14 = vld [vmem:[%s4273_s29 + $0xd] sm:$0x1]  ;;  %v2586_v18 = vsel %vm267_vm2, %v2585_v10, %v2584_v11  ;;  %v2770_v19 = vld [vmem:[%s4273_s29 + $0x3d] sm:$0x1]  ;;  %v2777_v20 = vrot.slane %v2769_v12, 6  ;;  %v2967_v24 = vrot.slane %v2960_v15, 7  ;;  %p3986_p4 = scmp.ne.s32.totalorder %s4806_s6, %s3985_s7 }
  0x78   : > { %3687 = vmatprep.subr.mxu0 %v4077_v0  ;;  %v2776_v21 = vsel %vm264_vm1, %v2775_v13, %v2767_v14  ;;  %v2961_v22 = vld [vmem:[%s4273_s29 + $0x2e] sm:$0x1]  ;;  %v3152_v26 = vld [vmem:[%s4273_s29 + $0x1f] sm:$0x1]  ;;  %v2588_v27 = vsel %vm270_vm3, %v2587_v17, %v2586_v18  ;;  %v2779_v28 = vrot.slane %v2770_v19, 5  ;;  %s4083_s24 = smov [#allocation7]  }
  0x79   : > { %v2959_v25 = vld [vmem:[%s4273_s29 + $0xe] sm:$0x1]  ;;  %v2778_v29 = vsel %vm267_vm2, %v2777_v20, %v2776_v21  ;;  %v2962_v30 = vld [vmem:[%s4273_s29 + $0x3e] sm:$0x1]  ;;  %v2969_v31 = vrot.slane %v2961_v22, 6  ;;  %v3159_v34 = vrot.slane %v3152_v26, 7  ;;  %p3987_p6 = pnand %p3986_p4, %p4210_p10 }
  0x7a   : > { %3678 = vmatmul.mubr.msk.f32.vlgmr.msra.gmra.mrb[12].mxu0 %vm272_vm5, %v4296_v9  ;;  %v2968_v32 = vsel %vm264_vm1, %v2967_v24, %v2959_v25  ;;  %v3153_v33 = vld [vmem:[%s4273_s29 + $0x2f] sm:$0x1]  ;;  %v2780_v36 = vsel %vm270_vm3, %v2779_v28, %v2778_v29  ;;  %v3154_v39 = vld [vmem:[%s4273_s29 + $0x3f] sm:$0x1]  ;;  %v252_v46 = vld [vmem:[%s4862_s2] sm:$0x3] }
  0x7b   : > { %3688 = vmatpush3.msk.msra.mxu0 %vm276_vm4, %v1628_v37  ;;  %3689 = vmatprep.mubr.msk.f32.mxu0 %vm4078_vm0, %v4077_v0  ;;  %v3151_v35 = vld [vmem:[%s4273_s29 + $0xf] sm:$0x1]  ;;  %v2971_v37 = vrot.slane %v2962_v30, 5  ;;  %v2970_v38 = vsel %vm267_vm2, %v2969_v31, %v2968_v32  ;;  %v3161_v40 = vrot.slane %v3153_v33, 6  ;;  %v3163_v43 = vrot.slane %v3154_v39, 5  ;;  %p3988_p8 = pneg %p3987_p6  ;;  %s3989_s29 = sshll.u32 %s4083_s24, 4  ;;  %s3990_s29 = int_to_ptr.vmem [resolvable:$false] %s3989_s29 }
  0x7c   : > { %3699 = vmatprep.subr.mxu0 %v4077_v0  ;;  %v3160_v41 = vsel %vm264_vm1, %v3159_v34, %v3151_v35  ;;  %s3991_s23 = scalar_lea.vmem %s3990_s29, 1024  ;;  %p3992_p12 = scmp.lt.s32.totalorder %s4806_s6, %s3990_s29 }
  0x7d   : > { %v2972_v42 = vsel %vm270_vm3, %v2971_v37, %v2970_v38  ;;  %v3162_v44 = vsel %vm267_vm2, %v3161_v40, %v3160_v41  ;;  %p3993_p11 = scmp.lt.s32.totalorder %s3991_s23, %s3985_s7 }
  0x7e   : > { %3690 = vmatmul.mubr.msk.f32.vlgmr.msra.gmra.mrb[14].mxu0 %vm272_vm5, %v4296_v9  ;;  %v3164_v45 = vsel %vm270_vm3, %v3163_v43, %v3162_v44 }
  0x7f   : > { %3700 = vmatpush3.msk.msra.mxu0 %vm276_vm4, %v1820_v47  ;;  %3701 = vmatprep.mubr.msk.f32.mxu0 %vm4078_vm0, %v4077_v0  ;;  %v4080_v47 = vmov 0   ;;  %p3994_p0 = por %p3993_p11, %p3992_p12 }
  0x80   : > { %3711 = vmatprep.subr.mxu0 %v4077_v0  ;;  %3926 = vset.pattern.permute.xlu0 %v4080_v47 }
  0x81   : > { %431 = vperm.xlu0 %3926, %v252_v46   ;;  %p3995_p5 = pnand %p3994_p0, %p3988_p8 }
  0x82   : > { %3702 = vmatmul.mubr.msk.f32.vlgmr.msra.gmra.mrb[16].mxu0 %vm272_vm5, %v4296_v9 }
  0x83   : > { %3712 = vmatpush3.msk.msra.mxu0 %vm276_vm4, %v2012_v57  ;;  %3713 = vmatprep.mubr.msk.f32.mxu0 %vm4078_vm0, %v4077_v0 }
  0x84   : > { %3723 = vmatprep.subr.mxu0 %v4077_v0 }
  0x86   : > { %3714 = vmatmul.mubr.msk.f32.vlgmr.msra.gmra.mrb[18].mxu0 %vm272_vm5, %v4296_v9 }
  0x87   : > { %3724 = vmatpush3.msk.msra.mxu0 %vm276_vm4, %v2204_v5  ;;  %3725 = vmatprep.mubr.msk.f32.mxu0 %vm4078_vm0, %v4077_v0 }
  0x88   : > { %3735 = vmatprep.subr.mxu0 %v4077_v0 }
  0x8a   : > { %3726 = vmatmul.mubr.msk.f32.vlgmr.msra.gmra.mrb[20].mxu0 %vm272_vm5, %v4296_v9 }
  0x8b   : > { %3736 = vmatpush3.msk.msra.mxu0 %vm276_vm4, %v2396_v16  ;;  %3737 = vmatprep.mubr.msk.f32.mxu0 %vm4078_vm0, %v4077_v0 }
  0x8c   : > { %3747 = vmatprep.subr.mxu0 %v4077_v0 }
  0x8e   : > { %3738 = vmatmul.mubr.msk.f32.vlgmr.msra.gmra.mrb[22].mxu0 %vm272_vm5, %v4296_v9 }
  0x8f   : > { %3748 = vmatpush3.msk.msra.mxu0 %vm276_vm4, %v2588_v27  ;;  %3749 = vmatprep.mubr.msk.f32.mxu0 %vm4078_vm0, %v4077_v0 }
  0x90   : > { %3759 = vmatprep.subr.mxu0 %v4077_v0 }
  0x92   : > { %3750 = vmatmul.mubr.msk.f32.vlgmr.msra.gmra.mrb[24].mxu0 %vm272_vm5, %v4296_v9 }
  0x93   : > { %3760 = vmatpush3.msk.msra.mxu0 %vm276_vm4, %v2780_v36  ;;  %3761 = vmatprep.mubr.msk.f32.mxu0 %vm4078_vm0, %v4077_v0 }
  0x94   : > { %3771 = vmatprep.subr.mxu0 %v4077_v0 }
  0x96   : > { %3762 = vmatmul.mubr.msk.f32.vlgmr.msra.gmra.mrb[26].mxu0 %vm272_vm5, %v4296_v9 }
  0x97   : > { %3772 = vmatpush3.msk.msra.mxu0 %vm276_vm4, %v2972_v42  ;;  %3773 = vmatprep.mubr.msk.f32.mxu0 %vm4078_vm0, %v4077_v0 }
  0x98   : > { %3783 = vmatprep.subr.mxu0 %v4077_v0 }
  0x9a   : > { %3774 = vmatmul.mubr.msk.f32.vlgmr.msra.gmra.mrb[28].mxu0 %vm272_vm5, %v4296_v9 }
  0x9b   : > { %3784 = vmatpush3.msk.msra.mxu0 %vm276_vm4, %v3164_v45  ;;  %3785 = vmatprep.mubr.msk.f32.mxu0 %vm4078_vm0, %v4077_v0 }
  0x9e   : > { %3786 = vmatmul.mubr.msk.f32.vlgmr.msra.gmra.mrb[30].mxu0 %vm272_vm5, %v4296_v9 }
 0x135   : > { %v345_v48 = vpop.f32.mrb[0].mxu0 }
 0x136   : > { %v3607_v49 = vpop.f32.mrb[1].mxu0  ;;  %3613 = vmatmul.mubr.msk.f32.vlgmr.msra.gmra.mrb[0].mxu1 %vm349_vm6, %v345_v48  ;;  %v4082_v48 = vmov 1966171168  }
 0x137   : > { %3800 = vmatpush3.bf16.msra.mxu1 %v4306_v23  ;;  %3624 = vmatprep.mubr.msk.f32.mxu1 %vm4078_vm0, %v4077_v0  ;;  %v437_v49 = vunpack.c.l.s4 %v4082_v48 }
 0x138   : > { %3801 = vmatprep.subr.bf16.mxu1 %v4079_v1 }
 0x139   : > { %v545_v9 = vpop.f32.mrb[2].mxu0 }
 0x13a   : > { %v3619_v50 = vpop.f32.mrb[3].mxu0  ;;  %3625 = vmatmul.mubr.msk.f32.vlgmr.msra.gmra.mrb[2].mxu1 %vm349_vm6, %v545_v9  ;;  %v439_v9 = vlaneseq }
 0x13b   : > { %3803 = vmatpush3.bf16.msra.mxu1 %v4306_v23  ;;  %3636 = vmatprep.mubr.msk.f32.mxu1 %vm4078_vm0, %v4077_v0  ;;  %v4639_v50 = vpop.permute.xlu0 %431 }
 0x13c   : > { %3804 = vmatprep.subr.bf16.mxu1 %v4079_v1 }
 0x13d   : > { %v737_v51 = vpop.f32.mrb[4].mxu0 }
 0x13e   : > { %v3631_v52 = vpop.f32.mrb[5].mxu0  ;;  %3637 = vmatmul.mubr.msk.f32.vlgmr.msra.gmra.mrb[4].mxu1 %vm349_vm6, %v737_v51  ;;  %v438_v51 = vunpack.c.0.s8 %v437_v49 }
 0x13f   : > { %3806 = vmatpush3.bf16.msra.mxu1 %v4306_v23  ;;  %3648 = vmatprep.mubr.msk.f32.mxu1 %vm4078_vm0, %v4077_v0  ;;  %v440_v52 = vshrl.u32 %v439_v9, 7 }
 0x140   : > { %3807 = vmatprep.subr.bf16.mxu1 %v4079_v1 }
 0x141   : > { %v929_v53 = vpop.f32.mrb[6].mxu0 }
 0x142   : > { %v3643_v54 = vpop.f32.mrb[7].mxu0  ;;  %3649 = vmatmul.mubr.msk.f32.vlgmr.msra.gmra.mrb[6].mxu1 %vm349_vm6, %v929_v53  ;;  %v4641_v53 = vsub.s32 %v438_v51, %v440_v52 }
 0x143   : > { %3809 = vmatpush3.bf16.msra.mxu1 %v4306_v23  ;;  %3660 = vmatprep.mubr.msk.f32.mxu1 %vm4078_vm0, %v4077_v0 }
 0x144   : > { %3810 = vmatprep.subr.bf16.mxu1 %v4079_v1 }
 0x145   : > { %v1121_v55 = vpop.f32.mrb[8].mxu0 }
 0x146   : > { %v3655_v56 = vpop.f32.mrb[9].mxu0  ;;  %3661 = vmatmul.mubr.msk.f32.vlgmr.msra.gmra.mrb[8].mxu1 %vm349_vm6, %v1121_v55 }
 0x147   : > { %3812 = vmatpush3.bf16.msra.mxu1 %v4306_v23  ;;  %3672 = vmatprep.mubr.msk.f32.mxu1 %vm4078_vm0, %v4077_v0 }
 0x148   : > { %3813 = vmatprep.subr.bf16.mxu1 %v4079_v1 }
 0x149   : > { %v1313_v57 = vpop.f32.mrb[10].mxu0 }
 0x14a   : > { %v3667_v58 = vpop.f32.mrb[11].mxu0  ;;  %3673 = vmatmul.mubr.msk.f32.vlgmr.msra.gmra.mrb[10].mxu1 %vm349_vm6, %v1313_v57 }
 0x14b   : > { %3815 = vmatpush3.bf16.msra.mxu1 %v4306_v23  ;;  %3684 = vmatprep.mubr.msk.f32.mxu1 %vm4078_vm0, %v4077_v0 }
 0x14c   : > { %3816 = vmatprep.subr.bf16.mxu1 %v4079_v1 }
 0x14d   : > { %v1505_v59 = vpop.f32.mrb[12].mxu0 }
 0x14e   : > { %v3679_v60 = vpop.f32.mrb[13].mxu0  ;;  %3685 = vmatmul.mubr.msk.f32.vlgmr.msra.gmra.mrb[12].mxu1 %vm349_vm6, %v1505_v59 }
 0x14f   : > { %3818 = vmatpush3.bf16.msra.mxu1 %v4306_v23  ;;  %3696 = vmatprep.mubr.msk.f32.mxu1 %vm4078_vm0, %v4077_v0 }
 0x150   : > { %3819 = vmatprep.subr.bf16.mxu1 %v4079_v1 }
 0x151   : > { %v1697_v61 = vpop.f32.mrb[14].mxu0 }
 0x152   : > { %v3691_v62 = vpop.f32.mrb[15].mxu0  ;;  %3697 = vmatmul.mubr.msk.f32.vlgmr.msra.gmra.mrb[14].mxu1 %vm349_vm6, %v1697_v61 }
 0x153   : > { %3821 = vmatpush3.bf16.msra.mxu1 %v4306_v23  ;;  %3708 = vmatprep.mubr.msk.f32.mxu1 %vm4078_vm0, %v4077_v0 }
 0x154   : > { %3822 = vmatprep.subr.bf16.mxu1 %v4079_v1 }
 0x155   : > { %v1889_v63 = vpop.f32.mrb[16].mxu0 }
 0x156   : > { %v3703_v2 = vpop.f32.mrb[17].mxu0  ;;  %3709 = vmatmul.mubr.msk.f32.vlgmr.msra.gmra.mrb[16].mxu1 %vm349_vm6, %v1889_v63 }
 0x157   : > { %3824 = vmatpush3.bf16.msra.mxu1 %v4306_v23  ;;  %3720 = vmatprep.mubr.msk.f32.mxu1 %vm4078_vm0, %v4077_v0 }
 0x158   : > { %3825 = vmatprep.subr.bf16.mxu1 %v4079_v1 }
 0x159   : > { %v2081_v3 = vpop.f32.mrb[18].mxu0 }
 0x15a   : > { %v3715_v4 = vpop.f32.mrb[19].mxu0  ;;  %3721 = vmatmul.mubr.msk.f32.vlgmr.msra.gmra.mrb[18].mxu1 %vm349_vm6, %v2081_v3 }
 0x15b   : > { %3827 = vmatpush3.bf16.msra.mxu1 %v4306_v23  ;;  %3732 = vmatprep.mubr.msk.f32.mxu1 %vm4078_vm0, %v4077_v0 }
 0x15c   : > { %3828 = vmatprep.subr.bf16.mxu1 %v4079_v1 }
 0x15d   : > { %v2273_v5 = vpop.f32.mrb[20].mxu0 }
 0x15e   : > { %v3727_v6 = vpop.f32.mrb[21].mxu0  ;;  %3733 = vmatmul.mubr.msk.f32.vlgmr.msra.gmra.mrb[20].mxu1 %vm349_vm6, %v2273_v5 }
 0x15f   : > { %3830 = vmatpush3.bf16.msra.mxu1 %v4306_v23  ;;  %3744 = vmatprep.mubr.msk.f32.mxu1 %vm4078_vm0, %v4077_v0 }
 0x160   : > { %3831 = vmatprep.subr.bf16.mxu1 %v4079_v1 }
 0x161   : > { %v2465_v7 = vpop.f32.mrb[22].mxu0 }
 0x162   : > { %v3739_v8 = vpop.f32.mrb[23].mxu0  ;;  %3745 = vmatmul.mubr.msk.f32.vlgmr.msra.gmra.mrb[22].mxu1 %vm349_vm6, %v2465_v7 }
 0x163   : > { %3833 = vmatpush3.bf16.msra.mxu1 %v4306_v23  ;;  %3756 = vmatprep.mubr.msk.f32.mxu1 %vm4078_vm0, %v4077_v0 }
 0x164   : > { %3834 = vmatprep.subr.bf16.mxu1 %v4079_v1 }
 0x165   : > { %v2657_v10 = vpop.f32.mrb[24].mxu0 }
 0x166   : > { %v3751_v11 = vpop.f32.mrb[25].mxu0  ;;  %3757 = vmatmul.mubr.msk.f32.vlgmr.msra.gmra.mrb[24].mxu1 %vm349_vm6, %v2657_v10 }
 0x167   : > { %3836 = vmatpush3.bf16.msra.mxu1 %v4306_v23  ;;  %3768 = vmatprep.mubr.msk.f32.mxu1 %vm4078_vm0, %v4077_v0 }
 0x168   : > { %3837 = vmatprep.subr.bf16.mxu1 %v4079_v1 }
 0x169   : > { %v2849_v12 = vpop.f32.mrb[26].mxu0 }
 0x16a   : > { %v3763_v13 = vpop.f32.mrb[27].mxu0  ;;  %3769 = vmatmul.mubr.msk.f32.vlgmr.msra.gmra.mrb[26].mxu1 %vm349_vm6, %v2849_v12 }
 0x16b   : > { %3839 = vmatpush3.bf16.msra.mxu1 %v4306_v23  ;;  %3780 = vmatprep.mubr.msk.f32.mxu1 %vm4078_vm0, %v4077_v0 }
 0x16c   : > { %3840 = vmatprep.subr.bf16.mxu1 %v4079_v1 }
 0x16d   : > { %v3041_v14 = vpop.f32.mrb[28].mxu0 }
 0x16e   : > { %v3775_v15 = vpop.f32.mrb[29].mxu0  ;;  %3781 = vmatmul.mubr.msk.f32.vlgmr.msra.gmra.mrb[28].mxu1 %vm349_vm6, %v3041_v14 }
 0x16f   : > { %3842 = vmatpush3.bf16.msra.mxu1 %v4306_v23  ;;  %3792 = vmatprep.mubr.msk.f32.mxu1 %vm4078_vm0, %v4077_v0 }
 0x171   : > { %v3233_v16 = vpop.f32.mrb[30].mxu0 }
 0x172   : > { %v3787_v17 = vpop.f32.mrb[31].mxu0  ;;  %3793 = vmatmul.mubr.msk.f32.vlgmr.msra.gmra.mrb[30].mxu1 %vm349_vm6, %v3233_v16 }
 0x209   : > { %v419_v18 = vpop.f32.mrb[0].mxu1 }
 0x20a   : > { %424 = vrot.lane.b32.xlu0 %v419_v18, %s4081_s21  ;;  %v3614_v19 = vpop.f32.mrb[1].mxu1 }
 0x20d   : > { %v618_v20 = vpop.f32.mrb[2].mxu1 }
 0x20e   : > { %623 = vrot.lane.b32.xlu1 %v618_v20, %s4081_s21  ;;  %v3626_v1 = vpop.f32.mrb[3].mxu1 }
 0x211   : > { %v4583_v21 = vpop.f32.mrb[4].mxu1 }
 0x212   : > { %815 = vrot.lane.b32.xlu1 %v4583_v21, %s4081_s21  ;;  %v3638_v23 = vpop.f32.mrb[5].mxu1 }
 0x215   : > { %v4587_v0 = vpop.f32.mrb[6].mxu1 }
 0x216   : > { %1007 = vrot.lane.b32.xlu0 %v4587_v0, %s4081_s21  ;;  %v3650_v22 = vpop.f32.mrb[7].mxu1 }
 0x219   : > { %v4591_v24 = vpop.f32.mrb[8].mxu1 }
 0x21a   : > { %1199 = vrot.lane.b32.xlu1 %v4591_v24, %s4081_s21  ;;  %v3662_v25 = vpop.f32.mrb[9].mxu1 }
 0x21d   : > { %v4595_v26 = vpop.f32.mrb[10].mxu1 }
 0x21e   : > { %1391 = vrot.lane.b32.xlu0 %v4595_v26, %s4081_s21  ;;  %v3674_v27 = vpop.f32.mrb[11].mxu1 }
 0x221   : > { %v4599_v28 = vpop.f32.mrb[12].mxu1 }
 0x222   : > { %1583 = vrot.lane.b32.xlu1 %v4599_v28, %s4081_s21  ;;  %v3686_v29 = vpop.f32.mrb[13].mxu1 }
 0x225   : > { %v4603_v30 = vpop.f32.mrb[14].mxu1 }
 0x226   : > { %1775 = vrot.lane.b32.xlu0 %v4603_v30, %s4081_s21  ;;  %v3698_v31 = vpop.f32.mrb[15].mxu1 }
 0x229   : > { %v4607_v32 = vpop.f32.mrb[16].mxu1 }
 0x22a   : > { %1967 = vrot.lane.b32.xlu1 %v4607_v32, %s4081_s21  ;;  %v3710_v33 = vpop.f32.mrb[17].mxu1 }
 0x22d   : > { %v4611_v34 = vpop.f32.mrb[18].mxu1 }
 0x22e   : > { %2159 = vrot.lane.b32.xlu0 %v4611_v34, %s4081_s21  ;;  %v3722_v35 = vpop.f32.mrb[19].mxu1 }
 0x231   : > { %v4615_v36 = vpop.f32.mrb[20].mxu1 }
 0x232   : > { %2351 = vrot.lane.b32.xlu1 %v4615_v36, %s4081_s21  ;;  %v3734_v37 = vpop.f32.mrb[21].mxu1 }
 0x235   : > { %v4619_v38 = vpop.f32.mrb[22].mxu1 }
 0x236   : > { %2543 = vrot.lane.b32.xlu0 %v4619_v38, %s4081_s21  ;;  %v3746_v39 = vpop.f32.mrb[23].mxu1 }
 0x239   : > { %v4623_v40 = vpop.f32.mrb[24].mxu1 }
 0x23a   : > { %2735 = vrot.lane.b32.xlu1 %v4623_v40, %s4081_s21  ;;  %v3758_v41 = vpop.f32.mrb[25].mxu1 }
 0x23d   : > { %v4627_v42 = vpop.f32.mrb[26].mxu1 }
 0x23e   : > { %2927 = vrot.lane.b32.xlu0 %v4627_v42, %s4081_s21  ;;  %v3770_v43 = vpop.f32.mrb[27].mxu1 }
 0x241   : > { %v4631_v44 = vpop.f32.mrb[28].mxu1 }
 0x242   : > { %3119 = vrot.lane.b32.xlu1 %v4631_v44, %s4081_s21  ;;  %v3782_v45 = vpop.f32.mrb[29].mxu1 }
 0x245   : > { %v4635_v46 = vpop.f32.mrb[30].mxu1 }
 0x246   : > { %3311 = vrot.lane.b32.xlu0 %v4635_v46, %s4081_s21  ;;  %v3794_v47 = vpop.f32.mrb[31].mxu1 }
 0x27c   : > { %v425_v54 = vpop.permute.xlu0 %424 }
 0x27d   : > { %v428_v55 = vsel %vm427_vm7, %v419_v18, %v425_v54 }
 0x27e   : > { %v434_v56 = vadd.f32 %v4639_v50, %v428_v55 }
 0x280   : > { %v442_v57 = vrot.slane %v434_v56, %v4641_v53  ;;  %v624_v58 = vpop.permute.xlu1 %623 }
 0x281   : > { %v626_v59 = vsel %vm427_vm7, %v618_v20, %v624_v58 }
 0x282   : > { %v443_v60 = vcombine.high %v442_v57, %v442_v57  ;;  %v450_v61 = vrot.slane %v442_v57, %v4641_v53  ;;  %v627_v62 = vadd.f32 %v626_v59, %v4639_v50 }
 0x284   : > { %v457_v63 = vrot.slane %v443_v60, %v4641_v53  ;;  %461 = vst.msk [vmem:[%s4651_s28] sm:$0x1] %vm460_vm8, %v450_v61  ;;  %v635_v2 = vrot.slane %v627_v62, %v4641_v53  ;;  %v816_v3 = vpop.permute.xlu1 %815 }
 0x285   : > { %v818_v4 = vsel %vm427_vm7, %v4583_v21, %v816_v3 }
 0x286   : > { %462 = vst.msk [vmem:[%s4651_s28 + $0x10] sm:$0x1] %vm460_vm8, %v457_v63  ;;  %v636_v5 = vcombine.high %v635_v2, %v635_v2  ;;  %v643_v6 = vrot.slane %v635_v2, %v4641_v53  ;;  %v819_v7 = vadd.f32 %v818_v4, %v4639_v50 }
 0x288   : > { %v650_v8 = vrot.slane %v636_v5, %v4641_v53  ;;  %653 = vst.msk [vmem:[%s4651_s28 + $0x1] sm:$0x1] %vm460_vm8, %v643_v6  ;;  %v827_v10 = vrot.slane %v819_v7, %v4641_v53  ;;  %v1008_v11 = vpop.permute.xlu0 %1007 }
 0x289   : > { %v1010_v12 = vsel %vm427_vm7, %v4587_v0, %v1008_v11 }
 0x28a   : > { %654 = vst.msk [vmem:[%s4651_s28 + $0x11] sm:$0x1] %vm460_vm8, %v650_v8  ;;  %v828_v13 = vcombine.high %v827_v10, %v827_v10  ;;  %v835_v14 = vrot.slane %v827_v10, %v4641_v53  ;;  %v1011_v15 = vadd.f32 %v1010_v12, %v4639_v50 }
 0x28c   : > { %v842_v16 = vrot.slane %v828_v13, %v4641_v53  ;;  %845 = vst.msk [vmem:[%s4651_s28 + $0x2] sm:$0x1] %vm460_vm8, %v835_v14  ;;  %v1019_v17 = vrot.slane %v1011_v15, %v4641_v53  ;;  %v1200_v18 = vpop.permute.xlu1 %1199 }
 0x28d   : > { %v1202_v19 = vsel %vm427_vm7, %v4591_v24, %v1200_v18 }
 0x28e   : > { %846 = vst.msk [vmem:[%s4651_s28 + $0x12] sm:$0x1] %vm460_vm8, %v842_v16  ;;  %v1020_v20 = vcombine.high %v1019_v17, %v1019_v17  ;;  %v1027_v1 = vrot.slane %v1019_v17, %v4641_v53  ;;  %v1203_v21 = vadd.f32 %v1202_v19, %v4639_v50 }
 0x290   : > { %v1034_v23 = vrot.slane %v1020_v20, %v4641_v53  ;;  %1037 = vst.msk [vmem:[%s4651_s28 + $0x3] sm:$0x1] %vm460_vm8, %v1027_v1  ;;  %v1211_v0 = vrot.slane %v1203_v21, %v4641_v53  ;;  %v1392_v22 = vpop.permute.xlu0 %1391 }
 0x291   : > { %v1394_v25 = vsel %vm427_vm7, %v4595_v26, %v1392_v22 }
 0x292   : > { %1038 = vst.msk [vmem:[%s4651_s28 + $0x13] sm:$0x1] %vm460_vm8, %v1034_v23  ;;  %v1212_v24 = vcombine.high %v1211_v0, %v1211_v0  ;;  %v1219_v27 = vrot.slane %v1211_v0, %v4641_v53  ;;  %v1395_v29 = vadd.f32 %v1394_v25, %v4639_v50 }
 0x294   : > { %v1226_v31 = vrot.slane %v1212_v24, %v4641_v53  ;;  %1229 = vst.msk [vmem:[%s4651_s28 + $0x4] sm:$0x1] %vm460_vm8, %v1219_v27  ;;  %v1403_v33 = vrot.slane %v1395_v29, %v4641_v53  ;;  %v1584_v35 = vpop.permute.xlu1 %1583 }
 0x295   : > { %v1586_v37 = vsel %vm427_vm7, %v4599_v28, %v1584_v35 }
 0x296   : > { %1230 = vst.msk [vmem:[%s4651_s28 + $0x14] sm:$0x1] %vm460_vm8, %v1226_v31  ;;  %v1404_v26 = vcombine.high %v1403_v33, %v1403_v33  ;;  %v1411_v39 = vrot.slane %v1403_v33, %v4641_v53  ;;  %v1587_v41 = vadd.f32 %v1586_v37, %v4639_v50 }
 0x298   : > { %v1418_v43 = vrot.slane %v1404_v26, %v4641_v53  ;;  %1421 = vst.msk [vmem:[%s4651_s28 + $0x5] sm:$0x1] %vm460_vm8, %v1411_v39  ;;  %v1595_v45 = vrot.slane %v1587_v41, %v4641_v53  ;;  %v1776_v47 = vpop.permute.xlu0 %1775 }
 0x299   : > { %v1778_v48 = vsel %vm427_vm7, %v4603_v30, %v1776_v47 }
 0x29a   : > { %1422 = vst.msk [vmem:[%s4651_s28 + $0x15] sm:$0x1] %vm460_vm8, %v1418_v43  ;;  %v1596_v28 = vcombine.high %v1595_v45, %v1595_v45  ;;  %v1603_v49 = vrot.slane %v1595_v45, %v4641_v53  ;;  %v1779_v9 = vadd.f32 %v1778_v48, %v4639_v50 }
 0x29c   : > { %v1610_v51 = vrot.slane %v1596_v28, %v4641_v53  ;;  %1613 = vst.msk [vmem:[%s4651_s28 + $0x6] sm:$0x1] %vm460_vm8, %v1603_v49  ;;  %v1787_v52 = vrot.slane %v1779_v9, %v4641_v53  ;;  %v1968_v54 = vpop.permute.xlu1 %1967 }
 0x29d   : > { %v1970_v55 = vsel %vm427_vm7, %v4607_v32, %v1968_v54 }
 0x29e   : > { %1614 = vst.msk [vmem:[%s4651_s28 + $0x16] sm:$0x1] %vm460_vm8, %v1610_v51  ;;  %v1788_v30 = vcombine.high %v1787_v52, %v1787_v52  ;;  %v1795_v56 = vrot.slane %v1787_v52, %v4641_v53  ;;  %v1971_v57 = vadd.f32 %v1970_v55, %v4639_v50 }
 0x2a0   : > { %v1802_v58 = vrot.slane %v1788_v30, %v4641_v53  ;;  %1805 = vst.msk [vmem:[%s4651_s28 + $0x7] sm:$0x1] %vm460_vm8, %v1795_v56  ;;  %v1979_v59 = vrot.slane %v1971_v57, %v4641_v53  ;;  %v2160_v60 = vpop.permute.xlu0 %2159 }
 0x2a1   : > { %v2162_v61 = vsel %vm427_vm7, %v4611_v34, %v2160_v60 }
 0x2a2   : > { %1806 = vst.msk [vmem:[%s4651_s28 + $0x17] sm:$0x1] %vm460_vm8, %v1802_v58  ;;  %v1980_v32 = vcombine.high %v1979_v59, %v1979_v59  ;;  %v1987_v62 = vrot.slane %v1979_v59, %v4641_v53  ;;  %v2163_v63 = vadd.f32 %v2162_v61, %v4639_v50 }
 0x2a4   : > { %v1994_v2 = vrot.slane %v1980_v32, %v4641_v53  ;;  %1997 = vst.msk [vmem:[%s4651_s28 + $0x8] sm:$0x1] %vm460_vm8, %v1987_v62  ;;  %v2171_v3 = vrot.slane %v2163_v63, %v4641_v53  ;;  %v2352_v4 = vpop.permute.xlu1 %2351 }
 0x2a5   : > { %v2354_v5 = vsel %vm427_vm7, %v4615_v36, %v2352_v4 }
 0x2a6   : > { %1998 = vst.msk [vmem:[%s4651_s28 + $0x18] sm:$0x1] %vm460_vm8, %v1994_v2  ;;  %v2172_v34 = vcombine.high %v2171_v3, %v2171_v3  ;;  %v2179_v6 = vrot.slane %v2171_v3, %v4641_v53  ;;  %v2355_v7 = vadd.f32 %v2354_v5, %v4639_v50 }
 0x2a8   : > { %v2186_v8 = vrot.slane %v2172_v34, %v4641_v53  ;;  %2189 = vst.msk [vmem:[%s4651_s28 + $0x9] sm:$0x1] %vm460_vm8, %v2179_v6  ;;  %v2363_v10 = vrot.slane %v2355_v7, %v4641_v53  ;;  %v2544_v11 = vpop.permute.xlu0 %2543 }
 0x2a9   : > { %v2546_v12 = vsel %vm427_vm7, %v4619_v38, %v2544_v11 }
 0x2aa   : > { %2190 = vst.msk [vmem:[%s4651_s28 + $0x19] sm:$0x1] %vm460_vm8, %v2186_v8  ;;  %v2364_v36 = vcombine.high %v2363_v10, %v2363_v10  ;;  %v2371_v13 = vrot.slane %v2363_v10, %v4641_v53  ;;  %v2547_v14 = vadd.f32 %v2546_v12, %v4639_v50 }
 0x2ac   : > { %v2378_v15 = vrot.slane %v2364_v36, %v4641_v53  ;;  %2381 = vst.msk [vmem:[%s4651_s28 + $0xa] sm:$0x1] %vm460_vm8, %v2371_v13  ;;  %v2555_v16 = vrot.slane %v2547_v14, %v4641_v53  ;;  %v2736_v17 = vpop.permute.xlu1 %2735 }
 0x2ad   : > { %v2738_v18 = vsel %vm427_vm7, %v4623_v40, %v2736_v17 }
 0x2ae   : > { %2382 = vst.msk [vmem:[%s4651_s28 + $0x1a] sm:$0x1] %vm460_vm8, %v2378_v15  ;;  %v2556_v38 = vcombine.high %v2555_v16, %v2555_v16  ;;  %v2563_v19 = vrot.slane %v2555_v16, %v4641_v53  ;;  %v2739_v20 = vadd.f32 %v2738_v18, %v4639_v50 }
 0x2b0   : > { %v2570_v1 = vrot.slane %v2556_v38, %v4641_v53  ;;  %2573 = vst.msk [vmem:[%s4651_s28 + $0xb] sm:$0x1] %vm460_vm8, %v2563_v19  ;;  %v2747_v21 = vrot.slane %v2739_v20, %v4641_v53  ;;  %v2928_v23 = vpop.permute.xlu0 %2927 }
 0x2b1   : > { %v2930_v0 = vsel %vm427_vm7, %v4627_v42, %v2928_v23 }
 0x2b2   : > { %2574 = vst.msk [vmem:[%s4651_s28 + $0x1b] sm:$0x1] %vm460_vm8, %v2570_v1  ;;  %v2748_v40 = vcombine.high %v2747_v21, %v2747_v21  ;;  %v2755_v22 = vrot.slane %v2747_v21, %v4641_v53  ;;  %v2931_v25 = vadd.f32 %v2930_v0, %v4639_v50 }
 0x2b4   : > { %v2762_v24 = vrot.slane %v2748_v40, %v4641_v53  ;;  %2765 = vst.msk [vmem:[%s4651_s28 + $0xc] sm:$0x1] %vm460_vm8, %v2755_v22  ;;  %v2939_v27 = vrot.slane %v2931_v25, %v4641_v53  ;;  %v3120_v29 = vpop.permute.xlu1 %3119 }
 0x2b5   : > { %v3122_v31 = vsel %vm427_vm7, %v4631_v44, %v3120_v29 }
 0x2b6   : > { %2766 = vst.msk [vmem:[%s4651_s28 + $0x1c] sm:$0x1] %vm460_vm8, %v2762_v24  ;;  %v2940_v42 = vcombine.high %v2939_v27, %v2939_v27  ;;  %v2947_v33 = vrot.slane %v2939_v27, %v4641_v53  ;;  %v3123_v35 = vadd.f32 %v3122_v31, %v4639_v50 }
 0x2b8   : > { %v2954_v37 = vrot.slane %v2940_v42, %v4641_v53  ;;  %2957 = vst.msk [vmem:[%s4651_s28 + $0xd] sm:$0x1] %vm460_vm8, %v2947_v33  ;;  %v3131_v26 = vrot.slane %v3123_v35, %v4641_v53  ;;  %v3312_v39 = vpop.permute.xlu0 %3311 }
 0x2b9   : > { %v3314_v44 = vsel %vm427_vm7, %v4635_v46, %v3312_v39 }
 0x2ba   : > { %2958 = vst.msk [vmem:[%s4651_s28 + $0x1d] sm:$0x1] %vm460_vm8, %v2954_v37  ;;  %v3132_v41 = vcombine.high %v3131_v26, %v3131_v26  ;;  %v3139_v43 = vrot.slane %v3131_v26, %v4641_v53  ;;  %v3315_v45 = vadd.f32 %v3314_v44, %v4639_v50 }
 0x2bc   : > { %v3146_v47 = vrot.slane %v3132_v41, %v4641_v53  ;;  %3149 = vst.msk [vmem:[%s4651_s28 + $0xe] sm:$0x1] %vm460_vm8, %v3139_v43  ;;  %v3323_v48 = vrot.slane %v3315_v45, %v4641_v53 }
 0x2be   : > { %3150 = vst.msk [vmem:[%s4651_s28 + $0x1e] sm:$0x1] %vm460_vm8, %v3146_v47  ;;  %v3324_v46 = vcombine.high %v3323_v48, %v3323_v48  ;;  %v3331_v28 = vrot.slane %v3323_v48, %v4641_v53 }
 0x2c0   : > { %v3338_v50 = vrot.slane %v3324_v46, %v4641_v53  ;;  %3341 = vst.msk [vmem:[%s4651_s28 + $0xf] sm:$0x1] %vm460_vm8, %v3331_v28 }
 0x2c2   : > { %3342 = vst.msk [vmem:[%s4651_s28 + $0x1f] sm:$0x1] %vm460_vm8, %v3338_v50 }
 0x2c3   : > { %3998 = shalt.err (!%p3995_p5)
}
 0x2c4   : > { %s3999_s25 = scalar_lea.hbm %s4804_s13, 512  ;;  %s4003_s21 = scalar_lea.hbm %s4864_s4, 1024 }
 0x2c5   : > { %p4000_p9 = scmp.ne.s32.totalorder %s4804_s13, %s3999_s25  ;;  %p4004_p3 = scmp.lt.u32.totalorder %s4804_s13, %s4864_s4 }
 0x2c6   : > { %p4005_p7 = scmp.lt.u32.totalorder %s4003_s21, %s3999_s25  ;;  %p4007_p4 = scmp.lt.u32.totalorder %s3999_s25, %s4804_s13 }
 0x2c7   : > { %p4001_p1 = pnand %p4000_p9, %p4210_p10 }
 0x2c8   : > { %p4006_p13 = por %p4005_p7, %p4004_p3 }
 0x2c9   : > { %p4002_p2 = pneg %p4001_p1 }
 0x2ca   : > { %p4008_p6 = por %p4007_p4, %p4006_p13 }
 0x2cc   : > { %p4009_p8 = pnand %p4008_p6, %p4002_p2 }
 0x2ce   : > { %4012 = shalt.err (!%p4009_p8)
}
 0x2cf   : > { %s4084_s8 = smov 128   ;;  %s4085_s9 = smov 8  }
 0x2d0   : > { %3849 = dma.vmem_to_hbm [thread:$0]  (%p4210_p10), %s4806_s6, 512, %s4804_s13, %s3344_s18, %s4084_s8, %s4084_s8, %s4085_s9  }
 0x2d1 PF: > { %s3374_s11 = sand.u32 1, %s4051_s15   ;;  %p4882_p12 = scmp.ne.s32.totalorder %s4872_s26, 0 }
 0x2d2   : > { %p4883_p11 = scmp.ge.s32.totalorder %s4071_s20, 2  ;;  %s3375_s7 = scalar_lea.sflag [#allocation4], %s3374_s11 }
 0x2d4   : > { %p3860_p0 = pnand %p4883_p11, %p4882_p12 }
 0x2d6   : > { %4046 = dma.done.wait (!%p3860_p0), %s3375_s7, 512  }
 0x2d7   : > { %4048 = vsyncadd (!%p3860_p0), %s3375_s7, 4294966784  ;;  %s21_s20 = sadd.s32 1, %s4071_s20   ;;  %s4884_s15 = smov %s4055_s16 }
 0x2d8   : > { %p18_p5 = scmp.ge.s32.totalorder %s21_s20, 4   ;;  %s4885_s16 = smov %s4059_s17 }
 0x2d9   : > { %s4886_s17 = smov %s4219_s10  ;;  %s4887_s18 = smov %s4067_s19 }
 0x2da   : > { %s4888_s19 = smov %s4890_s5  ;;  %20 = sbr.rel (!%p18_p5) target bundleno = 7 (0x7), region = 85 }
 0x2e1   :  { %3380 = vsyncpa [#allocation3], 1 }
 0x2e2   :  { %3382 = vsyncpa [#allocation3 + $0x1], 1 }
 0x2e3   :  { %3383 = vsyncpa [#allocation6], 1 }
 0x2e4   :  { %3384 = vsyncpa [#allocation4], 1 }
 0x2e5   :  { %3386 = vsyncpa [#allocation4 + $0x1], 1 }

</bundles_post_ra>
